<compile_context>
chip_gen: v7x
topology: tpu7x:2x2x1
jax: 0.10.0
libtpu: 0.0.40
codegen_flags: <defaults>
</compile_context>

<pallas_src>
import functools
import math

import jax
import jax.numpy as jnp
from jax import lax
from jax.experimental import pallas as pl
from jax.experimental.pallas import tpu as pltpu


def mha_kernel(q_ref, k_ref, v_ref, wq_ref, wk_ref, wv_ref, wfc_ref,
               *out_refs, n_head, d_k, d_v, scale, with_attn):
    """One batch element, all heads fused.

    q_ref/k_ref/v_ref: (C, S)      channel-major activations (NCHW with HW flattened)
    wq_ref/wk_ref/wv_ref: (n_head*d, C)   PyTorch Conv2d 1x1 weights (out, in)
    wfc_ref: (C, n_head*d_v)       fc 1x1 conv weight (out, in)
    out_ref: (C, S)                fc output, channel-major
    attn_ref: (n_head, S, S)       attention maps (optional)
    o_scratch: (n_head*d_v, S)     concatenated per-head attention outputs
    """
    if with_attn:
        out_ref, attn_ref, o_scratch = out_refs
    else:
        out_ref, o_scratch = out_refs
        attn_ref = None

    # ---- 1x1-conv projections: one full-K=C MXU matmul each, channel-major ----
    q_proj = lax.dot_general(wq_ref[...], q_ref[...],
                             dimension_numbers=(((1,), (0,)), ((), ())),
                             preferred_element_type=jnp.float32)      # (n_head*d_k, S)
    k_proj = lax.dot_general(wk_ref[...], k_ref[...],
                             dimension_numbers=(((1,), (0,)), ((), ())),
                             preferred_element_type=jnp.float32)      # (n_head*d_k, S)
    v_proj = lax.dot_general(wv_ref[...], v_ref[...],
                             dimension_numbers=(((1,), (0,)), ((), ())),
                             preferred_element_type=jnp.float32)      # (n_head*d_v, S)

    # Fold the 1/sqrt(d_k) scaling onto Q (n_head*d_k x S) instead of each (S,S) score.
    # TODO(synk): softmax_attention source is not in the spec; the standard scaled
    # dot-product 1/sqrt(d_k) scaling is assumed here.
    q_proj = q_proj * scale

    # ---- per-head scores / softmax / A@V (d_k=32 contraction is inherent) ----
    for h in range(n_head):
        q_h = q_proj[h * d_k:(h + 1) * d_k, :]                        # (d_k, S) sublane slice
        k_h = k_proj[h * d_k:(h + 1) * d_k, :]
        v_h = v_proj[h * d_v:(h + 1) * d_v, :]

        # scores[sq, sk] = sum_d q_h[d, sq] * k_h[d, sk]
        scores = lax.dot_general(q_h, k_h,
                                 dimension_numbers=(((0,), (0,)), ((), ())),
                                 preferred_element_type=jnp.float32)   # (S, S)
        m = jnp.max(scores, axis=-1, keepdims=True)
        e = jnp.exp(scores - m)
        r = jnp.sum(e, axis=-1, keepdims=True)
        attn = e * pl.reciprocal(r, approx=False)   # exact recip per row + 1 mul/vreg

        if attn_ref is not None:
            attn_ref[h] = attn.astype(attn_ref.dtype)

        # o_h[d, sq] = sum_sk v_h[d, sk] * attn[sq, sk]
        o_h = lax.dot_general(v_h, attn,
                              dimension_numbers=(((1,), (1,)), ((), ())),
                              preferred_element_type=jnp.float32)      # (d_v, S)
        o_scratch[h * d_v:(h + 1) * d_v, :] = o_h

    # ---- fc (1x1 conv): ONE full-K matmul, channel-major output (no transpose) ----
    out_ref[...] = jnp.dot(wfc_ref[...], o_scratch[...],
                           preferred_element_type=jnp.float32).astype(out_ref.dtype)


@functools.partial(jax.jit, static_argnames=("n_head", "return_attn"))
def multihead_attention(q, k, v, params, *, n_head, return_attn=True):
    """Pallas forward of OurMultiheadAttention (attn_type='softmax').

    q, k, v: (B, C, H, W) NCHW like PyTorch.  params hold PyTorch-layout weights with
    the 1x1 spatial dims squeezed:
        wq / wk / wv: (n_head*d, C)      (Conv2d weight (out, in, 1, 1) -> (out, in))
        wfc:          (C, n_head*d_v)
    Returns (out (B, C, H, W), attn (B, n_head, H*W, H*W)) matching the module
    (attn is None when return_attn=False).
    """
    B, C, H, W = q.shape
    S = H * W
    wq, wk, wv, wfc = params["wq"], params["wk"], params["wv"], params["wfc"]
    d_k = wq.shape[0] // n_head
    d_v = wv.shape[0] // n_head
    scale = 1.0 / math.sqrt(d_k)

    # NCHW -> (B, C, S) is a pure reshape of the trailing dims: no data movement.
    q_cs = q.reshape(B, C, S)
    k_cs = k.reshape(B, C, S)
    v_cs = v.reshape(B, C, S)

    kernel = functools.partial(mha_kernel, n_head=n_head, d_k=d_k, d_v=d_v,
                               scale=scale, with_attn=return_attn)

    if return_attn:
        out_shape = (jax.ShapeDtypeStruct((B, C, S), jnp.float32),
                     jax.ShapeDtypeStruct((B, n_head, S, S), jnp.float32))
        out_specs = (pl.BlockSpec((None, C, S), lambda b: (b, 0, 0)),
                     pl.BlockSpec((None, n_head, S, S), lambda b: (b, 0, 0, 0)))
    else:
        out_shape = jax.ShapeDtypeStruct((B, C, S), jnp.float32)
        out_specs = pl.BlockSpec((None, C, S), lambda b: (b, 0, 0))

    # TODO(synk): for B == 1 (or odd B) on v7x, add a parallel q-row tile axis so both
    # TensorCores get work; at B >= 2 even, the batch axis already feeds both cores.
    results = pl.pallas_call(
        kernel,
        out_shape=out_shape,
        grid_spec=pltpu.PrefetchScalarGridSpec(
            num_scalar_prefetch=0,
            grid=(B,),
            in_specs=[
                pl.BlockSpec((None, C, S), lambda b: (b, 0, 0)),      # q (channel-major)
                pl.BlockSpec((None, C, S), lambda b: (b, 0, 0)),      # k
                pl.BlockSpec((None, C, S), lambda b: (b, 0, 0)),      # v
                pl.BlockSpec((n_head * d_k, C), lambda b: (0, 0)),    # wq (resident)
                pl.BlockSpec((n_head * d_k, C), lambda b: (0, 0)),    # wk
                pl.BlockSpec((n_head * d_v, C), lambda b: (0, 0)),    # wv
                pl.BlockSpec((C, n_head * d_v), lambda b: (0, 0)),    # wfc
            ],
            out_specs=out_specs,
            scratch_shapes=[pltpu.VMEM((n_head * d_v, S), jnp.float32)],
        ),
        compiler_params=pltpu.CompilerParams(
            dimension_semantics=("parallel",),
        ),
    )(q_cs, k_cs, v_cs, wq, wk, wv, wfc)

    if return_attn:
        out_cs, attn = results
    else:
        out_cs, attn = results, None

    out = out_cs.reshape(B, C, H, W)   # channel-major result -> NCHW, no transpose
    return out, attn

# TODO(synk): attn_type in {'dotproduct', 'patch', 'sparse_long', 'sparse_short'} are
# not implemented (only the default 'softmax' branch of the module is translated).


def multihead_attention_reference(q, k, v, params, n_head):
    """Pure-JAX reference for correctness checking (same math as the PyTorch module)."""
    B, C, H, W = q.shape
    S = H * W
    d_k = params["wq"].shape[0] // n_head
    d_v = params["wv"].shape[0] // n_head

    def proj(x, w_pt, d):
        y = jnp.einsum("oc,bcs->bos", w_pt, x.reshape(B, C, S))
        return y.reshape(B, n_head, d, S)

    Q = proj(q, params["wq"], d_k)
    K = proj(k, params["wk"], d_k)
    V = proj(v, params["wv"], d_v)

    scores = jnp.einsum("bnds,bndt->bnst", Q, K) / math.sqrt(d_k)
    attn = jax.nn.softmax(scores, axis=-1)
    O = jnp.einsum("bnst,bndt->bnsd", attn, V)                 # (B, n_head, S, d_v)
    O = jnp.transpose(O, (0, 1, 3, 2)).reshape(B, n_head * d_v, S)
    out = jnp.einsum("co,bos->bcs", params["wfc"], O).reshape(B, C, H, W)
    return out, attn


if __name__ == "__main__":
    # feat_dim=128 keeps channels lane-dense (128 lanes); H*W = 128 keeps the attention
    # map and spatial matmul dims lane/sublane-aligned.  d_k = feat_dim // n_head = 32,
    # matching the module's defaults.
    B, C, H, W = 2, 128, 8, 16
    n_head = 4
    d_k = d_v = C // n_head

    key = jax.random.PRNGKey(0)
    kq, kk, kv, k1, k2, k3, k4 = jax.random.split(key, 7)
    params = {
        "wq":  0.1 * jax.random.normal(k1, (n_head * d_k, C), jnp.float32),
        "wk":  0.1 * jax.random.normal(k2, (n_head * d_k, C), jnp.float32),
        "wv":  0.1 * jax.random.normal(k3, (n_head * d_v, C), jnp.float32),
        "wfc": 0.1 * jax.random.normal(k4, (C, n_head * d_v), jnp.float32),
    }
    q = jax.random.normal(kq, (B, C, H, W), jnp.float32)
    k = jax.random.normal(kk, (B, C, H, W), jnp.float32)
    v = jax.random.normal(kv, (B, C, H, W), jnp.float32)

    out, attn = jax.block_until_ready(
        multihead_attention(q, k, v, params, n_head=n_head))
    assert out.shape == (B, C, H, W), out.shape
    assert attn.shape == (B, n_head, H * W, H * W), attn.shape

    ref_out, ref_attn = jax.block_until_ready(
        multihead_attention_reference(q, k, v, params, n_head))
    assert jnp.allclose(attn, ref_attn, rtol=1e-4, atol=1e-4), "attn mismatch vs reference"
    assert jnp.allclose(out, ref_out, rtol=1e-4, atol=1e-4), "output mismatch vs reference"

    # Fast path that skips the O(S^2) attention-map writeback entirely.
    out_fast, attn_none = jax.block_until_ready(
        multihead_attention(q, k, v, params, n_head=n_head, return_attn=False))
    assert attn_none is None
    assert jnp.allclose(out_fast, ref_out, rtol=1e-4, atol=1e-4), "no-attn output mismatch"

    print("KERNEL_OK")
</pallas_src>

<mosaic_0001>
module attributes {stable_mosaic.version = 11 : i64} {
  func.func @mha_kernel(%arg0: i32, %arg1: memref<1x128x128xf32, #tpu.memory_space<vmem>>, %arg2: memref<1x128x128xf32, #tpu.memory_space<vmem>>, %arg3: memref<1x128x128xf32, #tpu.memory_space<vmem>>, %arg4: memref<128x128xf32, #tpu.memory_space<vmem>>, %arg5: memref<128x128xf32, #tpu.memory_space<vmem>>, %arg6: memref<128x128xf32, #tpu.memory_space<vmem>>, %arg7: memref<128x128xf32, #tpu.memory_space<vmem>>, %arg8: memref<1x128x128xf32, #tpu.memory_space<vmem>>, %arg9: memref<1x4x128x128xf32, #tpu.memory_space<vmem>>, %arg10: memref<128x128xf32, #tpu.memory_space<vmem>>) attributes {dimension_semantics = [#tpu.dimension_semantics<parallel>], iteration_bounds = array<i64: 2>, scalar_prefetch = 0 : i64, scratch_operands = 1 : i64, tpu.core_type = #tpu.core_type<tc>, window_params = [{transform_indices = @transform_0, window_bounds = array<i64: 1, 128, 128>}, {transform_indices = @transform_1, window_bounds = array<i64: 1, 128, 128>}, {transform_indices = @transform_2, window_bounds = array<i64: 1, 128, 128>}, {pipeline_mode = #tpu.pipeline_mode<synchronous>, transform_indices = @transform_3, window_bounds = array<i64: 128, 128>}, {pipeline_mode = #tpu.pipeline_mode<synchronous>, transform_indices = @transform_4, window_bounds = array<i64: 128, 128>}, {pipeline_mode = #tpu.pipeline_mode<synchronous>, transform_indices = @transform_5, window_bounds = array<i64: 128, 128>}, {pipeline_mode = #tpu.pipeline_mode<synchronous>, transform_indices = @transform_6, window_bounds = array<i64: 128, 128>}, {transform_indices = @transform_7, window_bounds = array<i64: 1, 128, 128>}, {transform_indices = @transform_8, window_bounds = array<i64: 1, 4, 128, 128>}]} {
    %c0 = arith.constant 0 : index
    %c0_0 = arith.constant 0 : index
    %0 = vector.load %arg4[%c0, %c0_0] : memref<128x128xf32, #tpu.memory_space<vmem>>, vector<128x128xf32>
    %c0_1 = arith.constant 0 : index
    %c0_2 = arith.constant 0 : index
    %c0_3 = arith.constant 0 : index
    %1 = vector.load %arg1[%c0_1, %c0_2, %c0_3] : memref<1x128x128xf32, #tpu.memory_space<vmem>>, vector<1x128x128xf32>
    %2 = vector.shape_cast %1 : vector<1x128x128xf32> to vector<128x128xf32>
    %cst = arith.constant dense<0.000000e+00> : vector<128x128xf32>
    %3 = tpu.matmul %0, %2, %cst {dimension_numbers = #tpu.dot_dimension_numbers<[1], [0], [0], [1], [0, 0, 1, 1], [], []>} : vector<128x128xf32>, vector<128x128xf32>, vector<128x128xf32> -> vector<128x128xf32>
    %c0_4 = arith.constant 0 : index
    %c0_5 = arith.constant 0 : index
    %4 = vector.load %arg5[%c0_4, %c0_5] : memref<128x128xf32, #tpu.memory_space<vmem>>, vector<128x128xf32>
    %c0_6 = arith.constant 0 : index
    %c0_7 = arith.constant 0 : index
    %c0_8 = arith.constant 0 : index
    %5 = vector.load %arg2[%c0_6, %c0_7, %c0_8] : memref<1x128x128xf32, #tpu.memory_space<vmem>>, vector<1x128x128xf32>
    %6 = vector.shape_cast %5 : vector<1x128x128xf32> to vector<128x128xf32>
    %cst_9 = arith.constant dense<0.000000e+00> : vector<128x128xf32>
    %7 = tpu.matmul %4, %6, %cst_9 {dimension_numbers = #tpu.dot_dimension_numbers<[1], [0], [0], [1], [0, 0, 1, 1], [], []>} : vector<128x128xf32>, vector<128x128xf32>, vector<128x128xf32> -> vector<128x128xf32>
    %c0_10 = arith.constant 0 : index
    %c0_11 = arith.constant 0 : index
    %8 = vector.load %arg6[%c0_10, %c0_11] : memref<128x128xf32, #tpu.memory_space<vmem>>, vector<128x128xf32>
    %c0_12 = arith.constant 0 : index
    %c0_13 = arith.constant 0 : index
    %c0_14 = arith.constant 0 : index
    %9 = vector.load %arg3[%c0_12, %c0_13, %c0_14] : memref<1x128x128xf32, #tpu.memory_space<vmem>>, vector<1x128x128xf32>
    %10 = vector.shape_cast %9 : vector<1x128x128xf32> to vector<128x128xf32>
    %cst_15 = arith.constant dense<0.000000e+00> : vector<128x128xf32>
    %11 = tpu.matmul %8, %10, %cst_15 {dimension_numbers = #tpu.dot_dimension_numbers<[1], [0], [0], [1], [0, 0, 1, 1], [], []>} : vector<128x128xf32>, vector<128x128xf32>, vector<128x128xf32> -> vector<128x128xf32>
    %cst_16 = arith.constant 0.176776692 : f32
    %12 = vector.broadcast %cst_16 : f32 to vector<128x128xf32>
    %13 = arith.mulf %3, %12 : vector<128x128xf32>
    %14 = vector.extract_strided_slice %13 {offsets = [0, 0], sizes = [32, 128], strides = [1, 1]} : vector<128x128xf32> to vector<32x128xf32>
    %15 = vector.extract_strided_slice %7 {offsets = [0, 0], sizes = [32, 128], strides = [1, 1]} : vector<128x128xf32> to vector<32x128xf32>
    %16 = vector.extract_strided_slice %11 {offsets = [0, 0], sizes = [32, 128], strides = [1, 1]} : vector<128x128xf32> to vector<32x128xf32>
    %cst_17 = arith.constant dense<0.000000e+00> : vector<128x128xf32>
    %17 = tpu.matmul %14, %15, %cst_17 {dimension_numbers = #tpu.dot_dimension_numbers<[0], [0], [1], [1], [0, 1, 1, 1], [], []>} : vector<32x128xf32>, vector<32x128xf32>, vector<128x128xf32> -> vector<128x128xf32>
    %cst_18 = arith.constant dense<0xFF800000> : vector<128xf32>
    %18 = vector.multi_reduction <maximumf>, %17, %cst_18 [1] : vector<128x128xf32> to vector<128xf32>
    %19 = vector.shape_cast %18 : vector<128xf32> to vector<128x1xf32>
    %20 = vector.broadcast %19 : vector<128x1xf32> to vector<128x128xf32>
    %21 = arith.subf %17, %20 : vector<128x128xf32>
    %22 = math.exp %21 : vector<128x128xf32>
    %cst_19 = arith.constant dense<0.000000e+00> : vector<128xf32>
    %23 = vector.multi_reduction <add>, %22, %cst_19 [1] : vector<128x128xf32> to vector<128xf32>
    %24 = vector.shape_cast %23 : vector<128xf32> to vector<128x1xf32>
    %25 = tpu.reciprocal %24 : vector<128x1xf32> -> vector<128x1xf32>
    %26 = vector.broadcast %25 : vector<128x1xf32> to vector<128x128xf32>
    %27 = arith.mulf %22, %26 : vector<128x128xf32>
    %c0_20 = arith.constant 0 : index
    %c0_21 = arith.constant 0 : index
    %c0_22 = arith.constant 0 : index
    %c0_23 = arith.constant 0 : index
    %28 = vector.load %arg9[%c0_20, %c0_21, %c0_22, %c0_23] : memref<1x4x128x128xf32, #tpu.memory_space<vmem>>, vector<1x1x128x128xf32>
    %29 = vector.shape_cast %28 : vector<1x1x128x128xf32> to vector<128x128xf32>
    %30 = vector.shape_cast %27 : vector<128x128xf32> to vector<1x1x128x128xf32>
    tpu.vector_store %arg9[%c0_20, %c0_21, %c0_22, %c0_23], %30 {strides = array<i32>} : memref<1x4x128x128xf32, #tpu.memory_space<vmem>>, vector<1x1x128x128xf32>,
    %cst_24 = arith.constant dense<0.000000e+00> : vector<32x128xf32>
    %31 = tpu.matmul %16, %27, %cst_24 {dimension_numbers = #tpu.dot_dimension_numbers<[1], [1], [0], [0], [0, 0, 1, 0], [], []>} : vector<32x128xf32>, vector<128x128xf32>, vector<32x128xf32> -> vector<32x128xf32>
    %c0_25 = arith.constant 0 : index
    %c0_26 = arith.constant 0 : index
    %32 = vector.load %arg10[%c0_25, %c0_26] : memref<128x128xf32, #tpu.memory_space<vmem>>, vector<32x128xf32>
    tpu.vector_store %arg10[%c0_25, %c0_26], %31 {strides = array<i32>} : memref<128x128xf32, #tpu.memory_space<vmem>>, vector<32x128xf32>,
    %33 = vector.extract_strided_slice %13 {offsets = [32, 0], sizes = [32, 128], strides = [1, 1]} : vector<128x128xf32> to vector<32x128xf32>
    %34 = vector.extract_strided_slice %7 {offsets = [32, 0], sizes = [32, 128], strides = [1, 1]} : vector<128x128xf32> to vector<32x128xf32>
    %35 = vector.extract_strided_slice %11 {offsets = [32, 0], sizes = [32, 128], strides = [1, 1]} : vector<128x128xf32> to vector<32x128xf32>
    %cst_27 = arith.constant dense<0.000000e+00> : vector<128x128xf32>
    %36 = tpu.matmul %33, %34, %cst_27 {dimension_numbers = #tpu.dot_dimension_numbers<[0], [0], [1], [1], [0, 1, 1, 1], [], []>} : vector<32x128xf32>, vector<32x128xf32>, vector<128x128xf32> -> vector<128x128xf32>
    %cst_28 = arith.constant dense<0xFF800000> : vector<128xf32>
    %37 = vector.multi_reduction <maximumf>, %36, %cst_28 [1] : vector<128x128xf32> to vector<128xf32>
    %38 = vector.shape_cast %37 : vector<128xf32> to vector<128x1xf32>
    %39 = vector.broadcast %38 : vector<128x1xf32> to vector<128x128xf32>
    %40 = arith.subf %36, %39 : vector<128x128xf32>
    %41 = math.exp %40 : vector<128x128xf32>
    %cst_29 = arith.constant dense<0.000000e+00> : vector<128xf32>
    %42 = vector.multi_reduction <add>, %41, %cst_29 [1] : vector<128x128xf32> to vector<128xf32>
    %43 = vector.shape_cast %42 : vector<128xf32> to vector<128x1xf32>
    %44 = tpu.reciprocal %43 : vector<128x1xf32> -> vector<128x1xf32>
    %45 = vector.broadcast %44 : vector<128x1xf32> to vector<128x128xf32>
    %46 = arith.mulf %41, %45 : vector<128x128xf32>
    %c0_30 = arith.constant 0 : index
    %c1 = arith.constant 1 : index
    %c0_31 = arith.constant 0 : index
    %c0_32 = arith.constant 0 : index
    %47 = vector.load %arg9[%c0_30, %c1, %c0_31, %c0_32] : memref<1x4x128x128xf32, #tpu.memory_space<vmem>>, vector<1x1x128x128xf32>
    %48 = vector.shape_cast %47 : vector<1x1x128x128xf32> to vector<128x128xf32>
    %49 = vector.shape_cast %46 : vector<128x128xf32> to vector<1x1x128x128xf32>
    tpu.vector_store %arg9[%c0_30, %c1, %c0_31, %c0_32], %49 {strides = array<i32>} : memref<1x4x128x128xf32, #tpu.memory_space<vmem>>, vector<1x1x128x128xf32>,
    %cst_33 = arith.constant dense<0.000000e+00> : vector<32x128xf32>
    %50 = tpu.matmul %35, %46, %cst_33 {dimension_numbers = #tpu.dot_dimension_numbers<[1], [1], [0], [0], [0, 0, 1, 0], [], []>} : vector<32x128xf32>, vector<128x128xf32>, vector<32x128xf32> -> vector<32x128xf32>
    %c32 = arith.constant 32 : index
    %c0_34 = arith.constant 0 : index
    %51 = vector.load %arg10[%c32, %c0_34] : memref<128x128xf32, #tpu.memory_space<vmem>>, vector<32x128xf32>
    tpu.vector_store %arg10[%c32, %c0_34], %50 {strides = array<i32>} : memref<128x128xf32, #tpu.memory_space<vmem>>, vector<32x128xf32>,
    %52 = vector.extract_strided_slice %13 {offsets = [64, 0], sizes = [32, 128], strides = [1, 1]} : vector<128x128xf32> to vector<32x128xf32>
    %53 = vector.extract_strided_slice %7 {offsets = [64, 0], sizes = [32, 128], strides = [1, 1]} : vector<128x128xf32> to vector<32x128xf32>
    %54 = vector.extract_strided_slice %11 {offsets = [64, 0], sizes = [32, 128], strides = [1, 1]} : vector<128x128xf32> to vector<32x128xf32>
    %cst_35 = arith.constant dense<0.000000e+00> : vector<128x128xf32>
    %55 = tpu.matmul %52, %53, %cst_35 {dimension_numbers = #tpu.dot_dimension_numbers<[0], [0], [1], [1], [0, 1, 1, 1], [], []>} : vector<32x128xf32>, vector<32x128xf32>, vector<128x128xf32> -> vector<128x128xf32>
    %cst_36 = arith.constant dense<0xFF800000> : vector<128xf32>
    %56 = vector.multi_reduction <maximumf>, %55, %cst_36 [1] : vector<128x128xf32> to vector<128xf32>
    %57 = vector.shape_cast %56 : vector<128xf32> to vector<128x1xf32>
    %58 = vector.broadcast %57 : vector<128x1xf32> to vector<128x128xf32>
    %59 = arith.subf %55, %58 : vector<128x128xf32>
    %60 = math.exp %59 : vector<128x128xf32>
    %cst_37 = arith.constant dense<0.000000e+00> : vector<128xf32>
    %61 = vector.multi_reduction <add>, %60, %cst_37 [1] : vector<128x128xf32> to vector<128xf32>
    %62 = vector.shape_cast %61 : vector<128xf32> to vector<128x1xf32>
    %63 = tpu.reciprocal %62 : vector<128x1xf32> -> vector<128x1xf32>
    %64 = vector.broadcast %63 : vector<128x1xf32> to vector<128x128xf32>
    %65 = arith.mulf %60, %64 : vector<128x128xf32>
    %c0_38 = arith.constant 0 : index
    %c2 = arith.constant 2 : index
    %c0_39 = arith.constant 0 : index
    %c0_40 = arith.constant 0 : index
    %66 = vector.load %arg9[%c0_38, %c2, %c0_39, %c0_40] : memref<1x4x128x128xf32, #tpu.memory_space<vmem>>, vector<1x1x128x128xf32>
    %67 = vector.shape_cast %66 : vector<1x1x128x128xf32> to vector<128x128xf32>
    %68 = vector.shape_cast %65 : vector<128x128xf32> to vector<1x1x128x128xf32>
    tpu.vector_store %arg9[%c0_38, %c2, %c0_39, %c0_40], %68 {strides = array<i32>} : memref<1x4x128x128xf32, #tpu.memory_space<vmem>>, vector<1x1x128x128xf32>,
    %cst_41 = arith.constant dense<0.000000e+00> : vector<32x128xf32>
    %69 = tpu.matmul %54, %65, %cst_41 {dimension_numbers = #tpu.dot_dimension_numbers<[1], [1], [0], [0], [0, 0, 1, 0], [], []>} : vector<32x128xf32>, vector<128x128xf32>, vector<32x128xf32> -> vector<32x128xf32>
    %c64 = arith.constant 64 : index
    %c0_42 = arith.constant 0 : index
    %70 = vector.load %arg10[%c64, %c0_42] : memref<128x128xf32, #tpu.memory_space<vmem>>, vector<32x128xf32>
    tpu.vector_store %arg10[%c64, %c0_42], %69 {strides = array<i32>} : memref<128x128xf32, #tpu.memory_space<vmem>>, vector<32x128xf32>,
    %71 = vector.extract_strided_slice %13 {offsets = [96, 0], sizes = [32, 128], strides = [1, 1]} : vector<128x128xf32> to vector<32x128xf32>
    %72 = vector.extract_strided_slice %7 {offsets = [96, 0], sizes = [32, 128], strides = [1, 1]} : vector<128x128xf32> to vector<32x128xf32>
    %73 = vector.extract_strided_slice %11 {offsets = [96, 0], sizes = [32, 128], strides = [1, 1]} : vector<128x128xf32> to vector<32x128xf32>
    %cst_43 = arith.constant dense<0.000000e+00> : vector<128x128xf32>
    %74 = tpu.matmul %71, %72, %cst_43 {dimension_numbers = #tpu.dot_dimension_numbers<[0], [0], [1], [1], [0, 1, 1, 1], [], []>} : vector<32x128xf32>, vector<32x128xf32>, vector<128x128xf32> -> vector<128x128xf32>
    %cst_44 = arith.constant dense<0xFF800000> : vector<128xf32>
    %75 = vector.multi_reduction <maximumf>, %74, %cst_44 [1] : vector<128x128xf32> to vector<128xf32>
    %76 = vector.shape_cast %75 : vector<128xf32> to vector<128x1xf32>
    %77 = vector.broadcast %76 : vector<128x1xf32> to vector<128x128xf32>
    %78 = arith.subf %74, %77 : vector<128x128xf32>
    %79 = math.exp %78 : vector<128x128xf32>
    %cst_45 = arith.constant dense<0.000000e+00> : vector<128xf32>
    %80 = vector.multi_reduction <add>, %79, %cst_45 [1] : vector<128x128xf32> to vector<128xf32>
    %81 = vector.shape_cast %80 : vector<128xf32> to vector<128x1xf32>
    %82 = tpu.reciprocal %81 : vector<128x1xf32> -> vector<128x1xf32>
    %83 = vector.broadcast %82 : vector<128x1xf32> to vector<128x128xf32>
    %84 = arith.mulf %79, %83 : vector<128x128xf32>
    %c0_46 = arith.constant 0 : index
    %c3 = arith.constant 3 : index
    %c0_47 = arith.constant 0 : index
    %c0_48 = arith.constant 0 : index
    %85 = vector.load %arg9[%c0_46, %c3, %c0_47, %c0_48] : memref<1x4x128x128xf32, #tpu.memory_space<vmem>>, vector<1x1x128x128xf32>
    %86 = vector.shape_cast %85 : vector<1x1x128x128xf32> to vector<128x128xf32>
    %87 = vector.shape_cast %84 : vector<128x128xf32> to vector<1x1x128x128xf32>
    tpu.vector_store %arg9[%c0_46, %c3, %c0_47, %c0_48], %87 {strides = array<i32>} : memref<1x4x128x128xf32, #tpu.memory_space<vmem>>, vector<1x1x128x128xf32>,
    %cst_49 = arith.constant dense<0.000000e+00> : vector<32x128xf32>
    %88 = tpu.matmul %73, %84, %cst_49 {dimension_numbers = #tpu.dot_dimension_numbers<[1], [1], [0], [0], [0, 0, 1, 0], [], []>} : vector<32x128xf32>, vector<128x128xf32>, vector<32x128xf32> -> vector<32x128xf32>
    %c96 = arith.constant 96 : index
    %c0_50 = arith.constant 0 : index
    %89 = vector.load %arg10[%c96, %c0_50] : memref<128x128xf32, #tpu.memory_space<vmem>>, vector<32x128xf32>
    tpu.vector_store %arg10[%c96, %c0_50], %88 {strides = array<i32>} : memref<128x128xf32, #tpu.memory_space<vmem>>, vector<32x128xf32>,
    %c0_51 = arith.constant 0 : index
    %c0_52 = arith.constant 0 : index
    %90 = vector.load %arg7[%c0_51, %c0_52] : memref<128x128xf32, #tpu.memory_space<vmem>>, vector<128x128xf32>
    %c0_53 = arith.constant 0 : index
    %c0_54 = arith.constant 0 : index
    %91 = vector.load %arg10[%c0_53, %c0_54] : memref<128x128xf32, #tpu.memory_space<vmem>>, vector<128x128xf32>
    %cst_55 = arith.constant dense<0.000000e+00> : vector<128x128xf32>
    %92 = tpu.matmul %90, %91, %cst_55 {dimension_numbers = #tpu.dot_dimension_numbers<[1], [0], [0], [1], [0, 0, 1, 1], [], []>} : vector<128x128xf32>, vector<128x128xf32>, vector<128x128xf32> -> vector<128x128xf32>
    %c0_56 = arith.constant 0 : index
    %c0_57 = arith.constant 0 : index
    %c0_58 = arith.constant 0 : index
    %93 = vector.load %arg8[%c0_56, %c0_57, %c0_58] : memref<1x128x128xf32, #tpu.memory_space<vmem>>, vector<1x128x128xf32>
    %94 = vector.shape_cast %93 : vector<1x128x128xf32> to vector<128x128xf32>
    %95 = vector.shape_cast %92 : vector<128x128xf32> to vector<1x128x128xf32>
    tpu.vector_store %arg8[%c0_56, %c0_57, %c0_58], %95 {strides = array<i32>} : memref<1x128x128xf32, #tpu.memory_space<vmem>>, vector<1x128x128xf32>,
    return
  }
  func.func @transform_0(%arg0: i32) -> (i32, i32, i32) {
    %c0_i32 = arith.constant 0 : i32
    %c0_i32_0 = arith.constant 0 : i32
    %c0_i32_1 = arith.constant 0 : i32
    return %arg0, %c0_i32, %c0_i32_0 : i32, i32, i32
  }
  func.func @transform_1(%arg0: i32) -> (i32, i32, i32) {
    %c0_i32 = arith.constant 0 : i32
    %c0_i32_0 = arith.constant 0 : i32
    %c0_i32_1 = arith.constant 0 : i32
    return %arg0, %c0_i32, %c0_i32_0 : i32, i32, i32
  }
  func.func @transform_2(%arg0: i32) -> (i32, i32, i32) {
    %c0_i32 = arith.constant 0 : i32
    %c0_i32_0 = arith.constant 0 : i32
    %c0_i32_1 = arith.constant 0 : i32
    return %arg0, %c0_i32, %c0_i32_0 : i32, i32, i32
  }
  func.func @transform_3(%arg0: i32) -> (i32, i32) {
    %c0_i32 = arith.constant 0 : i32
    %c0_i32_0 = arith.constant 0 : i32
    %c0_i32_1 = arith.constant 0 : i32
    return %c0_i32, %c0_i32_0 : i32, i32
  }
  func.func @transform_4(%arg0: i32) -> (i32, i32) {
    %c0_i32 = arith.constant 0 : i32
    %c0_i32_0 = arith.constant 0 : i32
    %c0_i32_1 = arith.constant 0 : i32
    return %c0_i32, %c0_i32_0 : i32, i32
  }
  func.func @transform_5(%arg0: i32) -> (i32, i32) {
    %c0_i32 = arith.constant 0 : i32
    %c0_i32_0 = arith.constant 0 : i32
    %c0_i32_1 = arith.constant 0 : i32
    return %c0_i32, %c0_i32_0 : i32, i32
  }
  func.func @transform_6(%arg0: i32) -> (i32, i32) {
    %c0_i32 = arith.constant 0 : i32
    %c0_i32_0 = arith.constant 0 : i32
    %c0_i32_1 = arith.constant 0 : i32
    return %c0_i32, %c0_i32_0 : i32, i32
  }
  func.func @transform_7(%arg0: i32) -> (i32, i32, i32) {
    %c0_i32 = arith.constant 0 : i32
    %c0_i32_0 = arith.constant 0 : i32
    %c0_i32_1 = arith.constant 0 : i32
    return %arg0, %c0_i32, %c0_i32_0 : i32, i32, i32
  }
  func.func @transform_8(%arg0: i32) -> (i32, i32, i32, i32) {
    %c0_i32 = arith.constant 0 : i32
    %c0_i32_0 = arith.constant 0 : i32
    %c0_i32_1 = arith.constant 0 : i32
    %c0_i32_2 = arith.constant 0 : i32
    return %arg0, %c0_i32, %c0_i32_0, %c0_i32_1 : i32, i32, i32, i32
  }
}

</mosaic_0001>

<bundles_post_ra>
// kernel: multihead_attention.1
= control target key start
LH: loop header
LB: loop body
LE: loop exit
PB: predicated region body
PF: predicated region fallthrough
CT: control target
= control target key end

     0   :  { %14 = vsyncpa [#allocation4], 0  ;;  %s5876_s0 = inlined_call_operand.vmem [shape: f32[2,128,128], index: 0, kind: input, shape index: {}]   ;;  %s5877_s1 = inlined_call_operand.vmem [shape: f32[2,128,128], index: 1, kind: input, shape index: {}]   ;;  %s5878_s2 = inlined_call_operand.vmem [shape: f32[2,128,128], index: 2, kind: input, shape index: {}]   ;;  %s5879_s3 = inlined_call_operand.vmem [shape: f32[128,128], index: 3, kind: input, shape index: {}]   ;;  %s5880_s4 = inlined_call_operand.vmem [shape: f32[128,128], index: 4, kind: input, shape index: {}]   ;;  %s5881_s5 = inlined_call_operand.vmem [shape: f32[128,128], index: 5, kind: input, shape index: {}]   ;;  %s5882_s6 = inlined_call_operand.vmem [shape: f32[128,128], index: 6, kind: input, shape index: {}]   ;;  %s5883_s7 = inlined_call_operand.vmem [shape: f32[2,128,128], index: 7, kind: output, shape index: {0}]   ;;  %s5884_s8 = inlined_call_operand.hbm [shape: f32[2,4,128,128], index: 8, kind: output, shape index: {1}]  }
   0x1   :  { %16 = vsyncpa [#allocation4 + $0x1], 0  ;;  %s4755_s27 = smov 0   ;;  %s4757_s28 = smov 0  }
   0x2   :  { %s4759_s29 = smov 0   ;;  %s4761_s30 = smov 0  }
   0x3 LB: > { %s4776_s9 = sadd.s32 4294967295, %s4705_s30   ;;  %s3130_s10 = sadd.s32 4294967294, %s4705_s30   ;;  %s4705_s30 = sphi %s4761_s30, %s5892_s30   ;;  %s4701_s29 = sphi %s4759_s29, %s5891_s29   ;;  %s4697_s28 = sphi %s4757_s28, %s5890_s28   ;;  %s4693_s27 = sphi %s4755_s27, %s5889_s27  }
   0x4   : > { %s4780_s11 = sadd.s32 1, %s4705_s30   ;;  %s217_s12 = sadd.s32 1, %s4701_s29 }
   0x5   : > { %s214_s13 = ssub.s32 %s4705_s30, %s4780_s11  ;;  %p227_p0 = scmp.ne.s32.totalorder %s4701_s29, %s4697_s28 }
   0x6   : > { %p215_p1 = scmp.eq.s32.totalorder %s214_s13, 0  ;;  %p228_p2 = scmp.eq.s32.totalorder %s4776_s9, 1 }
   0x7   : > { %p233_p3 = scmp.ne.s32.totalorder %s4697_s28, %s4693_s27  ;;  %p234_p4 = scmp.eq.s32.totalorder %s3130_s10, 1 }
   0x8   : > { %s4791_s14 = scalar_select %p215_p1, %s4701_s29, %s217_s12  }
   0x9   : > { %p4793_p5 = por %p228_p2, %p227_p0  ;;  %p4797_p6 = por %p234_p4, %p233_p3 }
   0xa   : > { %p3133_p7 = scmp.ge.s32.totalorder %s4705_s30, 1  ;;  %p288_p8 = scmp.lt.s32.totalorder %s4705_s30, 3 }
   0xc   : > { %p289_p9 = pnand %p3133_p7, %p288_p8 }
   0xd   : > { %p337_p10 = scmp.lt.s32.totalorder (!%p289_p9), %s4776_s9, 1  ;;  %v357_v0 = vld [vmem:[%s5879_s3] sm:$0xff] (!%p289_p9)  ;;  %v358_v50 = vld [vmem:[%s5879_s3 + $0x8] sm:$0xff] (!%p289_p9)  ;;  %v359_v51 = vld [vmem:[%s5879_s3 + $0x10] sm:$0xff] (!%p289_p9)  ;;  %vm936_vm0 = vcmask (!%p289_p9), 261120   ;;  %s3264_s20 = sshll.u32 (!%p289_p9), %s4776_s9, 13 }
   0xe   : > { %292 = sbr.rel (%p289_p9) target bundleno = 2136 (0x858), region = 48  ;;  %3585 = vmatprep.mubr.f32.mxu0 (!%p289_p9), %v357_v0  ;;  %v534_v1 = vld [vmem:[%s5880_s4] sm:$0xff] (!%p289_p9)  ;;  %v360_v52 = vld [vmem:[%s5879_s3 + $0x18] sm:$0xff] (!%p289_p9)  ;;  %v535_v54 = vld [vmem:[%s5880_s4 + $0x8] sm:$0xff] (!%p289_p9) }
   0xf   : > { %3641 = vmatprep.mubr.f32.mxu1 (!%p289_p9), %v534_v1  ;;  %v361_v53 = vld [vmem:[%s5879_s3 + $0x20] sm:$0xff] (!%p289_p9)  ;;  %v536_v55 = vld [vmem:[%s5880_s4 + $0x10] sm:$0xff] (!%p289_p9)  ;;  %v362_v56 = vld [vmem:[%s5879_s3 + $0x28] sm:$0xff] (!%p289_p9) }
  0x10   : > { %v363_v57 = vld [vmem:[%s5879_s3 + $0x30] sm:$0xff] (!%p289_p9)  ;;  %v537_v58 = vld [vmem:[%s5880_s4 + $0x18] sm:$0xff] (!%p289_p9)  ;;  %v538_v59 = vld [vmem:[%s5880_s4 + $0x20] sm:$0xff] (!%p289_p9) }
  0x11   : > { %v364_v60 = vld [vmem:[%s5879_s3 + $0x38] sm:$0xff] (!%p289_p9)  ;;  %v539_v61 = vld [vmem:[%s5880_s4 + $0x28] sm:$0xff] (!%p289_p9)  ;;  %v540_v62 = vld [vmem:[%s5880_s4 + $0x30] sm:$0xff] (!%p289_p9) }
  0x12   : > { %v541_v63 = vld [vmem:[%s5880_s4 + $0x38] sm:$0xff] (!%p289_p9)  ;;  %v542_v0 = vld [vmem:[%s5880_s4 + $0x40] sm:$0xff] (!%p289_p9)  ;;  %v543_v1 = vld [vmem:[%s5880_s4 + $0x48] sm:$0xff] (!%p289_p9) }
  0x15   : > { %s338_s19 = scalar_select %p337_p10, %s4776_s9, 1 }
  0x16   : > { %s4707_s9 = smov [#allocation3]  }
  0x17   : > { %s4811_s22 = sshll.u32 %s338_s19, 7 }
  0x18   : > { %s4817_s25 = scalar_lea.vmem %s5876_s0, %s4811_s22  ;;  %s4829_s12 = scalar_lea.vmem %s5877_s1, %s4811_s22 }
  0x19   : > { %v373_v2 = vld [vmem:[%s4817_s25] sm:$0xff]  ;;  %v374_v3 = vld [vmem:[%s4817_s25 + $0x8] sm:$0xff]  ;;  %v375_v4 = vld [vmem:[%s4817_s25 + $0x10] sm:$0xff]  ;;  %s5019_s18 = scalar_lea.vmem %s5878_s2, %s4811_s22 }
  0x1a   : > { %v4057_v5 = vpack.c.bf16 %v374_v3, %v373_v2  ;;  %v376_v6 = vld [vmem:[%s4817_s25 + $0x18] sm:$0xff]  ;;  %v377_v8 = vld [vmem:[%s4817_s25 + $0x20] sm:$0xff]  ;;  %v378_v9 = vld [vmem:[%s4817_s25 + $0x28] sm:$0xff] }
  0x1b   : > { %v4061_v7 = vpack.c.bf16 %v376_v6, %v375_v4  ;;  %v4065_v10 = vpack.c.bf16 %v378_v9, %v377_v8  ;;  %v379_v11 = vld [vmem:[%s4817_s25 + $0x30] sm:$0xff]  ;;  %v550_v12 = vld [vmem:[%s4829_s12] sm:$0xff]  ;;  %v551_v13 = vld [vmem:[%s4829_s12 + $0x8] sm:$0xff] }
  0x1c   : > { %4058 = vmatprep.subr.bf16.mxu0 %v4057_v5  ;;  %v380_v14 = vld [vmem:[%s4817_s25 + $0x38] sm:$0xff]  ;;  %v4089_v15 = vpack.c.bf16 %v551_v13, %v550_v12  ;;  %v552_v16 = vld [vmem:[%s4829_s12 + $0x10] sm:$0xff]  ;;  %v554_v19 = vld [vmem:[%s4829_s12 + $0x20] sm:$0xff] }
  0x1d   : > { %4060 = vmatpush3.bf16.msra.mxu0 %v4057_v5  ;;  %v553_v17 = vld [vmem:[%s4829_s12 + $0x18] sm:$0xff]  ;;  %v555_v20 = vld [vmem:[%s4829_s12 + $0x28] sm:$0xff]  ;;  %v4069_v21 = vpack.c.bf16 %v380_v14, %v379_v11  ;;  %v381_v22 = vld [vmem:[%s4817_s25 + $0x40] sm:$0xff] }
  0x1e   : > { %4062 = vmatprep.subr.bf16.mxu0 %v4061_v7  ;;  %v4093_v18 = vpack.c.bf16 %v553_v17, %v552_v16  ;;  %4090 = vmatprep.subr.bf16.mxu1 %v4089_v15  ;;  %v382_v23 = vld [vmem:[%s4817_s25 + $0x48] sm:$0xff]  ;;  %v4097_v24 = vpack.c.bf16 %v555_v20, %v554_v19  ;;  %v556_v25 = vld [vmem:[%s4829_s12 + $0x30] sm:$0xff]  ;;  %v557_v26 = vld [vmem:[%s4829_s12 + $0x38] sm:$0xff] }
  0x1f   : > { %4092 = vmatpush3.bf16.msra.mxu1 %v4089_v15  ;;  %v4073_v27 = vpack.c.bf16 %v382_v23, %v381_v22  ;;  %v383_v28 = vld [vmem:[%s4817_s25 + $0x50] sm:$0xff]  ;;  %v384_v29 = vld [vmem:[%s4817_s25 + $0x58] sm:$0xff]  ;;  %v4101_v30 = vpack.c.bf16 %v557_v26, %v556_v25  ;;  %v558_v31 = vld [vmem:[%s4829_s12 + $0x40] sm:$0xff] }
  0x20   : > { %4094 = vmatprep.subr.bf16.mxu1 %v4093_v18  ;;  %v559_v32 = vld [vmem:[%s4829_s12 + $0x48] sm:$0xff]  ;;  %v4077_v33 = vpack.c.bf16 %v384_v29, %v383_v28  ;;  %v385_v34 = vld [vmem:[%s4817_s25 + $0x60] sm:$0xff]  ;;  %v560_v37 = vld [vmem:[%s4829_s12 + $0x50] sm:$0xff] }
  0x21   : > { %4064 = vmatpush3.bf16.msra.mxu0 %v4061_v7  ;;  %v386_v35 = vld [vmem:[%s4817_s25 + $0x68] sm:$0xff]  ;;  %v4105_v36 = vpack.c.bf16 %v559_v32, %v558_v31  ;;  %v561_v38 = vld [vmem:[%s4829_s12 + $0x58] sm:$0xff]  ;;  %v387_v40 = vld [vmem:[%s4817_s25 + $0x70] sm:$0xff] }
  0x22   : > { %4066 = vmatprep.subr.bf16.mxu0 %v4065_v10  ;;  %v4081_v39 = vpack.c.bf16 %v386_v35, %v385_v34  ;;  %v388_v41 = vld [vmem:[%s4817_s25 + $0x78] sm:$0xff]  ;;  %v4109_v42 = vpack.c.bf16 %v561_v38, %v560_v37  ;;  %v562_v43 = vld [vmem:[%s4829_s12 + $0x60] sm:$0xff]  ;;  %v563_v44 = vld [vmem:[%s4829_s12 + $0x68] sm:$0xff]  ;;  %s5888_s25 = sand.u32 1, %s4697_s28  }
  0x23   : > { %4096 = vmatpush3.bf16.msra.mxu1 %v4093_v18  ;;  %v4085_v45 = vpack.c.bf16 %v388_v41, %v387_v40  ;;  %v4113_v46 = vpack.c.bf16 %v563_v44, %v562_v43  ;;  %v564_v47 = vld [vmem:[%s4829_s12 + $0x70] sm:$0xff]  ;;  %v565_v48 = vld [vmem:[%s4829_s12 + $0x78] sm:$0xff]  ;;  %v546_v4 = vld [vmem:[%s5880_s4 + $0x60] sm:$0xff]  ;;  %s5885_s12 = sand.u32 1, %s4697_s28   ;;  %s5813_s26 = scalar_lea.sflag [#allocation4], %s5888_s25 }
  0x24   : > { %4098 = vmatprep.subr.bf16.mxu1 %v4097_v24  ;;  %v4117_v49 = vpack.c.bf16 %v565_v48, %v564_v47  ;;  %v544_v2 = vld [vmem:[%s5880_s4 + $0x50] sm:$0xff]  ;;  %v545_v3 = vld [vmem:[%s5880_s4 + $0x58] sm:$0xff]  ;;  %v547_v5 = vld [vmem:[%s5880_s4 + $0x68] sm:$0xff]  ;;  %s3134_s13 = sshll.u32 %s5885_s12, 9  ;;  %s5807_s12 = scalar_lea.hbm %s5884_s8, %s3264_s20 }
  0x25   : > { %4068 = vmatpush3.bf16.msra.mxu0 %v4065_v10  ;;  %v548_v6 = vld [vmem:[%s5880_s4 + $0x70] sm:$0xff]  ;;  %v549_v7 = vld [vmem:[%s5880_s4 + $0x78] sm:$0xff]  ;;  %s5311_s17 = scalar_lea.vmem [#allocation3], %s3134_s13 }
  0x26   : > { %4070 = vmatprep.subr.bf16.mxu0 %v4069_v21  ;;  %s3019_s21 = sshll.u32 %s5311_s17, 4  ;;  %s5809_s21 = int_to_ptr.vmem [resolvable:$true] %s3019_s21 }
  0x27   : > { %4100 = vmatpush3.bf16.msra.mxu1 %v4097_v24  ;;  %s4643_s10 = scalar_lea.vmem %s5809_s21, 8192 }
  0x28   : > { %4102 = vmatprep.subr.bf16.mxu1 %v4101_v30  ;;  %p4644_p11 = scmp.ne.s32.totalorder %s5809_s21, %s4643_s10 }
  0x29   : > { %4072 = vmatpush3.bf16.msra.mxu0 %v4069_v21 }
  0x2a   : > { %4074 = vmatprep.subr.bf16.mxu0 %v4073_v27  ;;  %p4645_p12 = pnand %p4644_p11, %p4793_p5 }
  0x2b   : > { %4104 = vmatpush3.bf16.msra.mxu1 %v4101_v30 }
  0x2c   : > { %4106 = vmatprep.subr.bf16.mxu1 %v4105_v36  ;;  %p4646_p13 = pneg %p4645_p12 }
  0x2d   : > { %4076 = vmatpush3.bf16.msra.mxu0 %v4073_v27 }
  0x2e   : > { %4078 = vmatprep.subr.bf16.mxu0 %v4077_v33 }
  0x2f   : > { %4108 = vmatpush3.bf16.msra.mxu1 %v4105_v36 }
  0x30   : > { %4110 = vmatprep.subr.bf16.mxu1 %v4109_v42 }
  0x31   : > { %4080 = vmatpush3.bf16.msra.mxu0 %v4077_v33 }
  0x32   : > { %4082 = vmatprep.subr.bf16.mxu0 %v4081_v39 }
  0x33   : > { %4112 = vmatpush3.bf16.msra.mxu1 %v4109_v42 }
  0x34   : > { %4114 = vmatprep.subr.bf16.mxu1 %v4113_v46 }
  0x35   : > { %4084 = vmatpush3.bf16.msra.mxu0 %v4081_v39 }
  0x36   : > { %4086 = vmatprep.subr.bf16.mxu0 %v4085_v45 }
  0x37   : > { %4116 = vmatpush3.bf16.msra.mxu1 %v4113_v46 }
  0x38   : > { %4118 = vmatprep.subr.bf16.mxu1 %v4117_v49 }
  0x39   : > { %4088 = vmatpush3.bf16.msra.mxu0 %v4085_v45 }
  0x3b   : > { %4120 = vmatpush3.bf16.msra.mxu1 %v4117_v49 }
  0x3c   : > { %3586 = vmatmul.mubr.f32.vlgmr.msra.gmra.mrb[0].mxu0 %v358_v50 }
  0x3d   : > { %3588 = vmatprep.mubr.f32.mxu0 %v359_v51 }
  0x3e   : > { %3642 = vmatmul.mubr.f32.vlgmr.msra.gmra.mrb[0].mxu1 %v535_v54 }
  0x3f   : > { %3644 = vmatprep.mubr.f32.mxu1 %v536_v55 }
  0x40   : > { %3589 = vmatmul.mubr.f32.gmra.mrb[2].mxu0 %v360_v52 }
  0x41   : > { %3591 = vmatprep.mubr.f32.mxu0 %v361_v53 }
  0x42   : > { %3645 = vmatmul.mubr.f32.gmra.mrb[2].mxu1 %v537_v58 }
  0x43   : > { %3647 = vmatprep.mubr.f32.mxu1 %v538_v59 }
  0x44   : > { %3592 = vmatmul.mubr.f32.gmra.mrb[4].mxu0 %v362_v56 }
  0x45   : > { %3594 = vmatprep.mubr.f32.mxu0 %v363_v57 }
  0x46   : > { %3648 = vmatmul.mubr.f32.gmra.mrb[4].mxu1 %v539_v61 }
  0x47   : > { %3650 = vmatprep.mubr.f32.mxu1 %v540_v62 }
  0x48   : > { %3595 = vmatmul.mubr.f32.gmra.mrb[6].mxu0 %v364_v60 }
  0x4a   : > { %3651 = vmatmul.mubr.f32.gmra.mrb[6].mxu1 %v541_v63 }
  0x4b   : > { %3653 = vmatprep.mubr.f32.mxu1 %v542_v0 }
  0x4e   : > { %3654 = vmatmul.mubr.f32.gmra.mrb[8].mxu1 %v543_v1 }
  0x4f   : > { %3656 = vmatprep.mubr.f32.mxu1 %v544_v2 }
  0x52   : > { %3657 = vmatmul.mubr.f32.gmra.mrb[10].mxu1 %v545_v3 }
  0x53   : > { %3659 = vmatprep.mubr.f32.mxu1 %v546_v4 }
  0x56   : > { %3660 = vmatmul.mubr.f32.gmra.mrb[12].mxu1 %v547_v5 }
  0x57   : > { %3662 = vmatprep.mubr.f32.mxu1 %v548_v6 }
  0x5a   : > { %3663 = vmatmul.mubr.f32.gmra.mrb[14].mxu1 %v549_v7 }
 0x10f   : > { %v3587_v8 = vpop.f32.mrb[0].mxu0 }
 0x110   : > { %v455_v9 = vpop.f32.mrb[1].mxu0  ;;  %v889_v14 = vmul.f32 0.17677669, %v3587_v8 }
 0x111   : > { %v888_v10 = vmul.f32 0.17677669, %v455_v9  ;;  %v3643_v13 = vpop.f32.mrb[0].mxu1 }
 0x112   : > { %v632_v15 = vpop.f32.mrb[1].mxu1 }
 0x113   : > { %904 = vxpose.xlu0.b32.start [1/4] (short) %v888_v10, 128  ;;  %v3590_v11 = vpop.f32.mrb[2].mxu0  ;;  %v4153_v16 = vpack.c.bf16 %v3643_v13, %v632_v15 }
 0x114   : > { %v465_v12 = vpop.f32.mrb[3].mxu0  ;;  %v891_v27 = vmul.f32 0.17677669, %v3590_v11 }
 0x115   : > { %v890_v17 = vmul.f32 0.17677669, %v465_v12  ;;  %v3646_v20 = vpop.f32.mrb[2].mxu1  ;;  %4154 = vmatprep.subr.bf16.mxu1 %v4153_v16 }
 0x116   : > { %v642_v22 = vpop.f32.mrb[3].mxu1  ;;  %4156 = vmatpush3.bf16.msra.mxu1 %v4153_v16  ;;  %v365_v16 = vld [vmem:[%s5879_s3 + $0x40] sm:$0xff] }
 0x117   : > { %905 = vxpose.xlu0.b32.cont [2/4] (short) %v889_v14, 128  ;;  %v3593_v18 = vpop.f32.mrb[4].mxu0  ;;  %v4157_v23 = vpack.c.bf16 %v3646_v20, %v642_v22  ;;  %3597 = vmatprep.mubr.f32.mxu0 %v365_v16  ;;  %v369_v20 = vld [vmem:[%s5879_s3 + $0x60] sm:$0xff]  ;;  %v371_v22 = vld [vmem:[%s5879_s3 + $0x70] sm:$0xff] }
 0x118   : > { %v475_v19 = vpop.f32.mrb[5].mxu0  ;;  %v893_v24 = vmul.f32 0.17677669, %v3593_v18  ;;  %v367_v18 = vld [vmem:[%s5879_s3 + $0x50] sm:$0xff] }
 0x119   : > { %v892_v21 = vmul.f32 0.17677669, %v475_v19  ;;  %4158 = vmatprep.subr.bf16.mxu1 %v4157_v23  ;;  %v3649_v30 = vpop.f32.mrb[4].mxu1  ;;  %v368_v19 = vld [vmem:[%s5879_s3 + $0x58] sm:$0xff] }
 0x11a   : > { %4160 = vmatpush3.bf16.msra.mxu1 %v4157_v23  ;;  %v652_v31 = vpop.f32.mrb[5].mxu1  ;;  %v372_v23 = vld [vmem:[%s5879_s3 + $0x78] sm:$0xff] }
 0x11b   : > { %906 = vxpose.xlu0.b32.cont [3/4] (short) %v890_v17, 128  ;;  %1379 = vxpose.xlu1.b32.start [1/4] (short) %v892_v21, 128  ;;  %v3596_v25 = vpop.f32.mrb[6].mxu0  ;;  %v4193_v32 = vpack.c.bf16 %v3649_v30, %v652_v31  ;;  %v366_v17 = vld [vmem:[%s5879_s3 + $0x48] sm:$0xff] }
 0x11c   : > { %v485_v26 = vpop.f32.mrb[7].mxu0  ;;  %v895_v29 = vmul.f32 0.17677669, %v3596_v25  ;;  %3598 = vmatmul.mubr.f32.gmra.mrb[8].mxu0 %v366_v17  ;;  %v370_v21 = vld [vmem:[%s5879_s3 + $0x68] sm:$0xff] }
 0x11d   : > { %v894_v28 = vmul.f32 0.17677669, %v485_v26  ;;  %4194 = vmatprep.subr.bf16.mxu1 %v4193_v32  ;;  %v3652_v33 = vpop.f32.mrb[6].mxu1  ;;  %3600 = vmatprep.mubr.f32.mxu0 %v367_v18  ;;  %v711_v18 = vld [vmem:[%s5881_s5] sm:$0xff] }
 0x11e   : > { %v662_v34 = vpop.f32.mrb[7].mxu1 }
 0x11f   : > { %907 = vxpose.xlu0.b32.end [4/4] (short) %v891_v27, 128  ;;  %1380 = vxpose.xlu1.b32.cont [2/4] (short) %v893_v24, 128  ;;  %v4197_v35 = vpack.c.bf16 %v3652_v33, %v662_v34 }
 0x120   : > { %3601 = vmatmul.mubr.f32.gmra.mrb[10].mxu0 %v368_v19  ;;  %v712_v19 = vld [vmem:[%s5881_s5 + $0x8] sm:$0xff] }
 0x121   : > { %v3655_v36 = vpop.f32.mrb[8].mxu1  ;;  %3603 = vmatprep.mubr.f32.mxu0 %v369_v20 }
 0x122   : > { %v672_v37 = vpop.f32.mrb[9].mxu1 }
 0x123   : > { %1381 = vxpose.xlu1.b32.cont [3/4] (short) %v894_v28, 128  ;;  %v4923_v38 = vpack.c.bf16 %v3655_v36, %v672_v37  ;;  %v727_v36 = vld [vmem:[%s5019_s18] sm:$0xff]  ;;  %v728_v37 = vld [vmem:[%s5019_s18 + $0x8] sm:$0xff] }
 0x124   : > { %3604 = vmatmul.mubr.f32.gmra.mrb[12].mxu0 %v370_v21 }
 0x125   : > { %v3658_v39 = vpop.f32.mrb[10].mxu1  ;;  %3606 = vmatprep.mubr.f32.mxu0 %v371_v22  ;;  %v713_v22 = vld [vmem:[%s5881_s5 + $0x10] sm:$0xff] }
 0x126   : > { %v682_v40 = vpop.f32.mrb[11].mxu1 }
 0x127   : > { %1382 = vxpose.xlu1.b32.end [4/4] (short) %v895_v29, 128  ;;  %v4925_v41 = vpack.c.bf16 %v3658_v39, %v682_v40  ;;  %v729_v39 = vld [vmem:[%s5019_s18 + $0x10] sm:$0xff]  ;;  %v4121_v40 = vpack.c.bf16 %v728_v37, %v727_v36  ;;  %v715_v36 = vld [vmem:[%s5881_s5 + $0x20] sm:$0xff]  ;;  %v716_v37 = vld [vmem:[%s5881_s5 + $0x28] sm:$0xff] }
 0x128   : > { %3607 = vmatmul.mubr.f32.gmra.mrb[14].mxu0 %v372_v23  ;;  %v714_v23 = vld [vmem:[%s5881_s5 + $0x18] sm:$0xff] }
 0x129   : > { %v3661_v42 = vpop.f32.mrb[12].mxu1  ;;  %4122 = vmatprep.subr.bf16.mxu0 %v4121_v40  ;;  %3697 = vmatprep.mubr.f32.mxu0 %v711_v18 }
 0x12a   : > { %v692_v43 = vpop.f32.mrb[13].mxu1  ;;  %4124 = vmatpush3.bf16.msra.mxu0 %v4121_v40  ;;  %v718_v40 = vld [vmem:[%s5881_s5 + $0x38] sm:$0xff] }
 0x12b   : > { %v4927_v44 = vpack.c.bf16 %v3661_v42, %v692_v43  ;;  %v730_v42 = vld [vmem:[%s5019_s18 + $0x18] sm:$0xff] }
 0x12c   : > { %v4125_v43 = vpack.c.bf16 %v730_v42, %v729_v39  ;;  %v717_v39 = vld [vmem:[%s5881_s5 + $0x30] sm:$0xff] }
 0x12d   : > { %v3664_v45 = vpop.f32.mrb[14].mxu1 }
 0x12e   : > { %v702_v46 = vpop.f32.mrb[15].mxu1  ;;  %4126 = vmatprep.subr.bf16.mxu0 %v4125_v43 }
 0x12f   : > { %v4929_v47 = vpack.c.bf16 %v3664_v45, %v702_v46  ;;  %v731_v45 = vld [vmem:[%s5019_s18 + $0x20] sm:$0xff]  ;;  %v732_v46 = vld [vmem:[%s5019_s18 + $0x28] sm:$0xff]  ;;  %4128 = vmatpush3.bf16.msra.mxu0 %v4125_v43 }
 0x193   : > { %v920_v48 = vpop.trf.xlu0 }
 0x194   : > { %3729 = vmatprep.mubr.msk.f32.mxu1 %vm936_vm0, %v920_v48 }
 0x197   : > { %v921_v49 = vpop.trf.xlu0 }
 0x198   : > { %3730 = vmatmul.mubr.msk.f32.vlgmr.msra.gmra.mrb[16].mxu1 %vm936_vm0, %v921_v49  ;;  %v4129_v49 = vpack.c.bf16 %v732_v46, %v731_v45 }
 0x199   : > { %4196 = vmatpush3.bf16.msra.mxu1 %v4193_v32 }
 0x19a   : > { %4198 = vmatprep.subr.bf16.mxu1 %v4197_v35  ;;  %4130 = vmatprep.subr.bf16.mxu0 %v4129_v49 }
 0x19b   : > { %v922_v50 = vpop.trf.xlu0  ;;  %v1395_v51 = vpop.trf.xlu1  ;;  %4132 = vmatpush3.bf16.msra.mxu0 %v4129_v49 }
 0x19c   : > { %3732 = vmatprep.mubr.msk.f32.mxu1 %vm936_vm0, %v922_v50 }
 0x19d   : > { %4200 = vmatpush3.bf16.msra.mxu1 %v4197_v35 }
 0x19f   : > { %v923_v52 = vpop.trf.xlu0  ;;  %v1396_v53 = vpop.trf.xlu1 }
 0x1a0   : > { %3733 = vmatmul.mubr.msk.f32.gmra.mrb[18].mxu1 %vm936_vm0, %v923_v52  ;;  %v734_v52 = vld [vmem:[%s5019_s18 + $0x38] sm:$0xff] }
 0x1a3   : > { %v924_v54 = vpop.trf.xlu0  ;;  %v1397_v55 = vpop.trf.xlu1 }
 0x1a4   : > { %3735 = vmatprep.mubr.msk.f32.mxu1 %vm936_vm0, %v924_v54  ;;  %v735_v54 = vld [vmem:[%s5019_s18 + $0x40] sm:$0xff] }
 0x1a7   : > { %v925_v56 = vpop.trf.xlu0  ;;  %v1398_v57 = vpop.trf.xlu1 }
 0x1a8   : > { %3736 = vmatmul.mubr.msk.f32.gmra.mrb[20].mxu1 %vm936_vm0, %v925_v56 }
 0x1ab   : > { %v926_v58 = vpop.trf.xlu0  ;;  %v1399_v59 = vpop.trf.xlu1 }
 0x1ac   : > { %3738 = vmatprep.mubr.msk.f32.mxu1 %vm936_vm0, %v926_v58 }
 0x1af   : > { %v927_v60 = vpop.trf.xlu0  ;;  %v1400_v61 = vpop.trf.xlu1 }
 0x1b0   : > { %3739 = vmatmul.mubr.msk.f32.gmra.mrb[22].mxu1 %vm936_vm0, %v927_v60 }
 0x1b3   : > { %v928_v62 = vpop.trf.xlu0  ;;  %v1401_v0 = vpop.trf.xlu1 }
 0x1b4   : > { %3741 = vmatprep.mubr.msk.f32.mxu1 %vm936_vm0, %v928_v62 }
 0x1b7   : > { %v929_v63 = vpop.trf.xlu0  ;;  %v1402_v2 = vpop.trf.xlu1 }
 0x1b8   : > { %3742 = vmatmul.mubr.msk.f32.gmra.mrb[24].mxu1 %vm936_vm0, %v929_v63 }
 0x1bb   : > { %v930_v1 = vpop.trf.xlu0  ;;  %v1403_v5 = vpop.trf.xlu1 }
 0x1bc   : > { %3744 = vmatprep.mubr.msk.f32.mxu1 %vm936_vm0, %v930_v1 }
 0x1bf   : > { %v931_v3 = vpop.trf.xlu0  ;;  %v1404_v7 = vpop.trf.xlu1 }
 0x1c0   : > { %3745 = vmatmul.mubr.msk.f32.gmra.mrb[26].mxu1 %vm936_vm0, %v931_v3  ;;  %v738_v3 = vld [vmem:[%s5019_s18 + $0x58] sm:$0xff] }
 0x1c3   : > { %v932_v4 = vpop.trf.xlu0  ;;  %v1405_v10 = vpop.trf.xlu1 }
 0x1c4   : > { %3747 = vmatprep.mubr.msk.f32.mxu1 %vm936_vm0, %v932_v4 }
 0x1c7   : > { %v933_v6 = vpop.trf.xlu0  ;;  %v1406_v11 = vpop.trf.xlu1 }
 0x1c8   : > { %3748 = vmatmul.mubr.msk.f32.gmra.mrb[28].mxu1 %vm936_vm0, %v933_v6 }
 0x1cb   : > { %v934_v8 = vpop.trf.xlu0  ;;  %v1407_v12 = vpop.trf.xlu1 }
 0x1cc   : > { %3750 = vmatprep.mubr.msk.f32.mxu1 %vm936_vm0, %v934_v8  ;;  %v740_v8 = vld [vmem:[%s5019_s18 + $0x68] sm:$0xff] }
 0x1cf   : > { %v935_v9 = vpop.trf.xlu0  ;;  %v1408_v13 = vpop.trf.xlu1 }
 0x1d0   : > { %3751 = vmatmul.mubr.msk.f32.gmra.mrb[30].mxu1 %vm936_vm0, %v935_v9 }
 0x1d1   : > { %3799 = vmatprep.mubr.msk.f32.mxu1 %vm936_vm0, %v1395_v51  ;;  %v733_v51 = vld [vmem:[%s5019_s18 + $0x30] sm:$0xff] }
 0x1d3   : > { %v1409_v14 = vpop.trf.xlu1 }
 0x1d4   : > { %3800 = vmatmul.mubr.msk.f32.vlgmr.msra.gmra.mrb[32].mxu1 %vm936_vm0, %v1396_v53  ;;  %v4133_v53 = vpack.c.bf16 %v734_v52, %v733_v51 }
 0x1d5   : > { %3802 = vmatprep.mubr.msk.f32.mxu1 %vm936_vm0, %v1397_v55  ;;  %v736_v55 = vld [vmem:[%s5019_s18 + $0x48] sm:$0xff] }
 0x1d6   : > { %4134 = vmatprep.subr.bf16.mxu0 %v4133_v53 }
 0x1d7   : > { %v1410_v15 = vpop.trf.xlu1  ;;  %4136 = vmatpush3.bf16.msra.mxu0 %v4133_v53 }
 0x1d8   : > { %3803 = vmatmul.mubr.msk.f32.gmra.mrb[34].mxu1 %vm936_vm0, %v1398_v57  ;;  %v4137_v57 = vpack.c.bf16 %v736_v55, %v735_v54 }
 0x1d9   : > { %3805 = vmatprep.mubr.msk.f32.mxu1 %vm936_vm0, %v1399_v59 }
 0x1da   : > { %4138 = vmatprep.subr.bf16.mxu0 %v4137_v57 }
 0x1db   : > { %4140 = vmatpush3.bf16.msra.mxu0 %v4137_v57 }
 0x1dc   : > { %3806 = vmatmul.mubr.msk.f32.gmra.mrb[36].mxu1 %vm936_vm0, %v1400_v61 }
 0x1dd   : > { %3808 = vmatprep.mubr.msk.f32.mxu1 %vm936_vm0, %v1401_v0 }
 0x1e0   : > { %3809 = vmatmul.mubr.msk.f32.gmra.mrb[38].mxu1 %vm936_vm0, %v1402_v2  ;;  %v737_v2 = vld [vmem:[%s5019_s18 + $0x50] sm:$0xff] }
 0x1e1   : > { %3811 = vmatprep.mubr.msk.f32.mxu1 %vm936_vm0, %v1403_v5  ;;  %v4141_v5 = vpack.c.bf16 %v738_v3, %v737_v2 }
 0x1e3   : > { %4142 = vmatprep.subr.bf16.mxu0 %v4141_v5 }
 0x1e4   : > { %3812 = vmatmul.mubr.msk.f32.gmra.mrb[40].mxu1 %vm936_vm0, %v1404_v7  ;;  %4144 = vmatpush3.bf16.msra.mxu0 %v4141_v5  ;;  %v739_v7 = vld [vmem:[%s5019_s18 + $0x60] sm:$0xff] }
 0x1e5   : > { %3814 = vmatprep.mubr.msk.f32.mxu1 %vm936_vm0, %v1405_v10  ;;  %v4145_v10 = vpack.c.bf16 %v740_v8, %v739_v7 }
 0x1e7   : > { %4146 = vmatprep.subr.bf16.mxu0 %v4145_v10 }
 0x1e8   : > { %3815 = vmatmul.mubr.msk.f32.gmra.mrb[42].mxu1 %vm936_vm0, %v1406_v11  ;;  %4148 = vmatpush3.bf16.msra.mxu0 %v4145_v10 }
 0x1e9   : > { %3817 = vmatprep.mubr.msk.f32.mxu1 %vm936_vm0, %v1407_v12  ;;  %v741_v12 = vld [vmem:[%s5019_s18 + $0x70] sm:$0xff] }
 0x1ec   : > { %3818 = vmatmul.mubr.msk.f32.gmra.mrb[44].mxu1 %vm936_vm0, %v1408_v13  ;;  %v742_v13 = vld [vmem:[%s5019_s18 + $0x78] sm:$0xff] }
 0x1ed   : > { %3820 = vmatprep.mubr.msk.f32.mxu1 %vm936_vm0, %v1409_v14 }
 0x1f0   : > { %3821 = vmatmul.mubr.msk.f32.gmra.mrb[46].mxu1 %vm936_vm0, %v1410_v15  ;;  %v4149_v15 = vpack.c.bf16 %v742_v13, %v741_v12 }
 0x1f2   : > { %4150 = vmatprep.subr.bf16.mxu0 %v4149_v15 }
 0x1f3   : > { %4152 = vmatpush3.bf16.msra.mxu0 %v4149_v15 }
 0x1f6   : > { %3698 = vmatmul.mubr.f32.vlgmr.msra.gmra.mrb[16].mxu0 %v712_v19 }
 0x1f7   : > { %3700 = vmatprep.mubr.f32.mxu0 %v713_v22 }
 0x1fa   : > { %3701 = vmatmul.mubr.f32.gmra.mrb[18].mxu0 %v714_v23 }
 0x1fb   : > { %3703 = vmatprep.mubr.f32.mxu0 %v715_v36 }
 0x1fe   : > { %3704 = vmatmul.mubr.f32.gmra.mrb[20].mxu0 %v716_v37 }
 0x1ff   : > { %3706 = vmatprep.mubr.f32.mxu0 %v717_v39 }
 0x202   : > { %3707 = vmatmul.mubr.f32.gmra.mrb[22].mxu0 %v718_v40 }
 0x26b   : > { %v4987_v24 = vpop.f32.mrb[16].mxu1 }
 0x26c   : > { %v4989_v25 = vpop.f32.mrb[17].mxu1  ;;  %1132 = vmax.xlane.f32.xlu1 %v4987_v24 }
 0x26d   : > { %1130 = vmax.xlane.f32.xlu0 %v4989_v25 }
 0x273   : > { %v4993_v26 = vpop.f32.mrb[18].mxu1 }
 0x274   : > { %v4995_v27 = vpop.f32.mrb[19].mxu1  ;;  %1136 = vmax.xlane.f32.xlu1 %v4993_v26 }
 0x278   : > { %1134 = vmax.xlane.f32.xlu1 %v4995_v27 }
 0x27b   : > { %v4999_v28 = vpop.f32.mrb[20].mxu1 }
 0x27c   : > { %v5001_v29 = vpop.f32.mrb[21].mxu1 }
 0x283   : > { %v5003_v30 = vpop.f32.mrb[22].mxu1 }
 0x284   : > { %v5005_v31 = vpop.f32.mrb[23].mxu1 }
 0x28b   : > { %v5007_v32 = vpop.f32.mrb[24].mxu1 }
 0x28c   : > { %v5009_v33 = vpop.f32.mrb[25].mxu1 }
 0x293   : > { %v5011_v34 = vpop.f32.mrb[26].mxu1 }
 0x294   : > { %v5013_v35 = vpop.f32.mrb[27].mxu1 }
 0x29b   : > { %v5027_v48 = vpop.f32.mrb[28].mxu1 }
 0x29c   : > { %v5029_v50 = vpop.f32.mrb[29].mxu1 }
 0x2a3   : > { %v5035_v56 = vpop.f32.mrb[30].mxu1 }
 0x2a4   : > { %v5037_v58 = vpop.f32.mrb[31].mxu1 }
 0x2a7   : > { %v5039_v59 = vpop.f32.mrb[32].mxu1 }
 0x2a8   : > { %1606 = vmax.xlane.f32.xlu1 %v5039_v59  ;;  %v5042_v60 = vpop.f32.mrb[33].mxu1 }
 0x2a9   : > { %1604 = vmax.xlane.f32.xlu0 %v5042_v60 }
 0x2ab   : > { %v5045_v61 = vpop.f32.mrb[34].mxu1 }
 0x2ac   : > { %1140 = vmax.xlane.f32.xlu1 %v4999_v28  ;;  %v5048_v62 = vpop.f32.mrb[35].mxu1 }
 0x2ad   : > { %1138 = vmax.xlane.f32.xlu0 %v5001_v29 }
 0x2af   : > { %v5051_v63 = vpop.f32.mrb[36].mxu1 }
 0x2b0   : > { %1610 = vmax.xlane.f32.xlu1 %v5045_v61  ;;  %v5054_v0 = vpop.f32.mrb[37].mxu1 }
 0x2b1   : > { %1608 = vmax.xlane.f32.xlu0 %v5048_v62 }
 0x2b3   : > { %v5057_v1 = vpop.f32.mrb[38].mxu1 }
 0x2b4   : > { %1144 = vmax.xlane.f32.xlu1 %v5003_v30  ;;  %v5062_v4 = vpop.f32.mrb[39].mxu1 }
 0x2b5   : > { %1142 = vmax.xlane.f32.xlu0 %v5005_v31 }
 0x2b7   : > { %v5065_v6 = vpop.f32.mrb[40].mxu1 }
 0x2b8   : > { %1614 = vmax.xlane.f32.xlu1 %v5051_v63  ;;  %v5070_v9 = vpop.f32.mrb[41].mxu1 }
 0x2b9   : > { %1612 = vmax.xlane.f32.xlu0 %v5054_v0 }
 0x2bb   : > { %v5073_v11 = vpop.f32.mrb[42].mxu1 }
 0x2bc   : > { %1148 = vmax.xlane.f32.xlu1 %v5007_v32  ;;  %v5078_v14 = vpop.f32.mrb[43].mxu1 }
 0x2bd   : > { %1146 = vmax.xlane.f32.xlu0 %v5009_v33 }
 0x2bf   : > { %v5081_v16 = vpop.f32.mrb[44].mxu1 }
 0x2c0   : > { %1618 = vmax.xlane.f32.xlu1 %v5057_v1  ;;  %v5084_v17 = vpop.f32.mrb[45].mxu1 }
 0x2c1   : > { %1616 = vmax.xlane.f32.xlu0 %v5062_v4 }
 0x2c3   : > { %v5093_v20 = vpop.f32.mrb[46].mxu1 }
 0x2c4   : > { %1152 = vmax.xlane.f32.xlu1 %v5011_v34  ;;  %v5096_v21 = vpop.f32.mrb[47].mxu1 }
 0x2c5   : > { %1150 = vmax.xlane.f32.xlu0 %v5013_v35 }
 0x2c8   : > { %1622 = vmax.xlane.f32.xlu1 %v5065_v6 }
 0x2c9   : > { %1620 = vmax.xlane.f32.xlu0 %v5070_v9 }
 0x2cc   : > { %1156 = vmax.xlane.f32.xlu1 %v5027_v48 }
 0x2cd   : > { %1154 = vmax.xlane.f32.xlu0 %v5029_v50 }
 0x2d0   : > { %1626 = vmax.xlane.f32.xlu1 %v5073_v11 }
 0x2d1   : > { %1624 = vmax.xlane.f32.xlu0 %v5078_v14 }
 0x2d4   : > { %1160 = vmax.xlane.f32.xlu1 %v5035_v56 }
 0x2d5   : > { %1158 = vmax.xlane.f32.xlu0 %v5037_v58 }
 0x2d8   : > { %1630 = vmax.xlane.f32.xlu1 %v5081_v16 }
 0x2d9   : > { %1628 = vmax.xlane.f32.xlu0 %v5084_v17 }
 0x2dc   : > { %1634 = vmax.xlane.f32.xlu1 %v5093_v20 }
 0x2dd   : > { %1632 = vmax.xlane.f32.xlu0 %v5096_v21 }
 0x2f9   : > { %v1133_v42 = vpop.xlane.xlu1 %1132 }
 0x2fa   : > { %v1163_v43 = vsub.f32 %v4987_v24, %v1133_v42  ;;  %v1131_v45 = vpop.xlane.xlu0 %1130 }
 0x2fb   : > { %v1162_v46 = vsub.f32 %v4989_v25, %v1131_v45 }
 0x2fc   : > { %v1180_v49 = vmul.f32 1.442695, %v1163_v43 }
 0x2fd   : > { %v1178_v51 = vmul.f32 1.442695, %v1162_v46 }
 0x2fe   : > { %4387 = vpow2.f32 %v1180_v49 }
 0x2ff   : > { %4389 = vpow2.f32 %v1178_v51 }
 0x301   : > { %v1137_v52 = vpop.xlane.xlu1 %1136 }
 0x302   : > { %v1165_v53 = vsub.f32 %v4993_v26, %v1137_v52  ;;  %v5145_v26 = vpop.f32.mrb[8].mxu0 }
 0x304   : > { %v1184_v54 = vmul.f32 1.442695, %v1165_v53 }
 0x305   : > { %v1135_v55 = vpop.xlane.xlu1 %1134 }
 0x306   : > { %4391 = vpow2.f32 %v1184_v54  ;;  %v1164_v57 = vsub.f32 %v4995_v27, %v1135_v55  ;;  %v5147_v27 = vpop.f32.mrb[9].mxu0 }
 0x307   : > { %v5149_v7 = vpop.f32.mrb[10].mxu0 }
 0x308   : > { %v5133_v2 = vpop.eup %4387  ;;  %v1182_v3 = vmul.f32 1.442695, %v1164_v57  ;;  %v5151_v8 = vpop.f32.mrb[11].mxu0 }
 0x309   : > { %v5135_v5 = vpop.eup %4389  ;;  %1212 = vadd.xlane.f32.xlu1 %v5133_v2  ;;  %v5153_v10 = vpop.f32.mrb[12].mxu0 }
 0x30a   : > { %4393 = vpow2.f32 %v1182_v3  ;;  %1210 = vadd.xlane.f32.xlu0 %v5135_v5  ;;  %v5155_v12 = vpop.f32.mrb[13].mxu0 }
 0x30b   : > { %v5157_v13 = vpop.f32.mrb[14].mxu0 }
 0x30c   : > { %v5159_v15 = vpop.f32.mrb[15].mxu0 }
 0x310   : > { %v5139_v24 = vpop.eup %4391 }
 0x311   : > { %1216 = vadd.xlane.f32.xlu1 %v5139_v24 }
 0x314   : > { %v5142_v25 = vpop.eup %4393 }
 0x315   : > { %1214 = vadd.xlane.f32.xlu0 %v5142_v25 }
 0x335   : > { %v1607_v18 = vpop.xlane.xlu1 %1606 }
 0x336   : > { %v1637_v19 = vsub.f32 %v5039_v59, %v1607_v18  ;;  %v1605_v22 = vpop.xlane.xlu0 %1604 }
 0x337   : > { %v1636_v23 = vsub.f32 %v5042_v60, %v1605_v22 }
 0x338   : > { %v1654_v36 = vmul.f32 1.442695, %v1637_v19 }
 0x339   : > { %v1652_v37 = vmul.f32 1.442695, %v1636_v23  ;;  %v1141_v39 = vpop.xlane.xlu1 %1140 }
 0x33a   : > { %4395 = vpow2.f32 %v1654_v36  ;;  %v1167_v40 = vsub.f32 %v4999_v28, %v1141_v39  ;;  %v1139_v42 = vpop.xlane.xlu0 %1138 }
 0x33b   : > { %4397 = vpow2.f32 %v1652_v37  ;;  %v1166_v43 = vsub.f32 %v5001_v29, %v1139_v42 }
 0x33c   : > { %v1188_v45 = vmul.f32 1.442695, %v1167_v40 }
 0x33d   : > { %v1186_v46 = vmul.f32 1.442695, %v1166_v43  ;;  %v1611_v49 = vpop.xlane.xlu1 %1610 }
 0x33e   : > { %4399 = vpow2.f32 %v1188_v45  ;;  %v1639_v51 = vsub.f32 %v5045_v61, %v1611_v49  ;;  %v1609_v59 = vpop.xlane.xlu0 %1608 }
 0x33f   : > { %4401 = vpow2.f32 %v1186_v46  ;;  %v1638_v60 = vsub.f32 %v5048_v62, %v1609_v59 }
 0x340   : > { %v1658_v52 = vmul.f32 1.442695, %v1639_v51 }
 0x341   : > { %v1656_v53 = vmul.f32 1.442695, %v1638_v60  ;;  %v1145_v54 = vpop.xlane.xlu1 %1144 }
 0x342   : > { %4403 = vpow2.f32 %v1658_v52  ;;  %v1169_v28 = vsub.f32 %v5003_v30, %v1145_v54  ;;  %v1143_v55 = vpop.xlane.xlu0 %1142 }
 0x343   : > { %4405 = vpow2.f32 %v1656_v53  ;;  %v1168_v29 = vsub.f32 %v5005_v31, %v1143_v55 }
 0x344   : > { %v5169_v57 = vpop.eup %4395  ;;  %v1192_v3 = vmul.f32 1.442695, %v1169_v28 }
 0x345   : > { %v5171_v18 = vpop.eup %4397  ;;  %v1190_v61 = vmul.f32 1.442695, %v1168_v29  ;;  %1686 = vadd.xlane.f32.xlu1 %v5169_v57  ;;  %v1615_v19 = vpop.xlane.xlu1 %1614 }
 0x346   : > { %4407 = vpow2.f32 %v1192_v3  ;;  %v1641_v62 = vsub.f32 %v5051_v63, %v1615_v19  ;;  %v1613_v22 = vpop.xlane.xlu0 %1612  ;;  %1684 = vadd.xlane.f32.xlu0 %v5171_v18 }
 0x347   : > { %4409 = vpow2.f32 %v1190_v61  ;;  %v1640_v30 = vsub.f32 %v5054_v0, %v1613_v22 }
 0x348   : > { %v5177_v23 = vpop.eup %4399  ;;  %v1662_v31 = vmul.f32 1.442695, %v1641_v62 }
 0x349   : > { %v5179_v36 = vpop.eup %4401  ;;  %v1660_v37 = vmul.f32 1.442695, %v1640_v30  ;;  %1220 = vadd.xlane.f32.xlu1 %v5177_v23  ;;  %v1149_v39 = vpop.xlane.xlu1 %1148 }
 0x34a   : > { %4411 = vpow2.f32 %v1662_v31  ;;  %v1171_v40 = vsub.f32 %v5007_v32, %v1149_v39  ;;  %v1147_v42 = vpop.xlane.xlu0 %1146  ;;  %1218 = vadd.xlane.f32.xlu0 %v5179_v36 }
 0x34b   : > { %4413 = vpow2.f32 %v1660_v37  ;;  %v1170_v63 = vsub.f32 %v5009_v33, %v1147_v42 }
 0x34c   : > { %v5185_v43 = vpop.eup %4403  ;;  %v1196_v0 = vmul.f32 1.442695, %v1171_v40 }
 0x34d   : > { %v5187_v45 = vpop.eup %4405  ;;  %v1194_v46 = vmul.f32 1.442695, %v1170_v63  ;;  %1690 = vadd.xlane.f32.xlu1 %v5185_v43  ;;  %v1619_v49 = vpop.xlane.xlu1 %1618 }
 0x34e   : > { %4415 = vpow2.f32 %v1196_v0  ;;  %v1643_v51 = vsub.f32 %v5057_v1, %v1619_v49  ;;  %v1617_v59 = vpop.xlane.xlu0 %1616  ;;  %1688 = vadd.xlane.f32.xlu0 %v5187_v45 }
 0x34f   : > { %4417 = vpow2.f32 %v1194_v46  ;;  %v1642_v32 = vsub.f32 %v5062_v4, %v1617_v59 }
 0x350   : > { %v5193_v60 = vpop.eup %4407  ;;  %v1666_v33 = vmul.f32 1.442695, %v1643_v51 }
 0x351   : > { %v5195_v52 = vpop.eup %4409  ;;  %v1664_v53 = vmul.f32 1.442695, %v1642_v32  ;;  %1224 = vadd.xlane.f32.xlu1 %v5193_v60  ;;  %v1153_v54 = vpop.xlane.xlu1 %1152 }
 0x352   : > { %4419 = vpow2.f32 %v1666_v33  ;;  %v1173_v28 = vsub.f32 %v5011_v34, %v1153_v54  ;;  %v1151_v55 = vpop.xlane.xlu0 %1150  ;;  %1222 = vadd.xlane.f32.xlu0 %v5195_v52 }
 0x353   : > { %4421 = vpow2.f32 %v1664_v53  ;;  %v1172_v1 = vsub.f32 %v5013_v35, %v1151_v55 }
 0x354   : > { %v5201_v29 = vpop.eup %4411  ;;  %v1200_v4 = vmul.f32 1.442695, %v1173_v28 }
 0x355   : > { %v5203_v3 = vpop.eup %4413  ;;  %v1198_v61 = vmul.f32 1.442695, %v1172_v1  ;;  %1694 = vadd.xlane.f32.xlu1 %v5201_v29  ;;  %v1623_v19 = vpop.xlane.xlu1 %1622 }
 0x356   : > { %4423 = vpow2.f32 %v1200_v4  ;;  %v1645_v62 = vsub.f32 %v5065_v6, %v1623_v19  ;;  %v1621_v22 = vpop.xlane.xlu0 %1620  ;;  %1692 = vadd.xlane.f32.xlu0 %v5203_v3 }
 0x357   : > { %4425 = vpow2.f32 %v1198_v61  ;;  %v1644_v34 = vsub.f32 %v5070_v9, %v1621_v22 }
 0x358   : > { %v5209_v30 = vpop.eup %4415  ;;  %v1670_v35 = vmul.f32 1.442695, %v1645_v62 }
 0x359   : > { %v5211_v31 = vpop.eup %4417  ;;  %v1668_v37 = vmul.f32 1.442695, %v1644_v34  ;;  %1228 = vadd.xlane.f32.xlu1 %v5209_v30  ;;  %v1157_v39 = vpop.xlane.xlu1 %1156 }
 0x35a   : > { %4427 = vpow2.f32 %v1670_v35  ;;  %v1175_v40 = vsub.f32 %v5027_v48, %v1157_v39  ;;  %v1155_v42 = vpop.xlane.xlu0 %1154  ;;  %1226 = vadd.xlane.f32.xlu0 %v5211_v31 }
 0x35b   : > { %4429 = vpow2.f32 %v1668_v37  ;;  %v1174_v6 = vsub.f32 %v5029_v50, %v1155_v42 }
 0x35c   : > { %v5217_v63 = vpop.eup %4419  ;;  %v1204_v9 = vmul.f32 1.442695, %v1175_v40 }
 0x35d   : > { %v5219_v0 = vpop.eup %4421  ;;  %v1202_v46 = vmul.f32 1.442695, %v1174_v6  ;;  %1698 = vadd.xlane.f32.xlu1 %v5217_v63  ;;  %v1627_v49 = vpop.xlane.xlu1 %1626 }
 0x35e   : > { %4431 = vpow2.f32 %v1204_v9  ;;  %v1647_v51 = vsub.f32 %v5073_v11, %v1627_v49  ;;  %v1625_v59 = vpop.xlane.xlu0 %1624  ;;  %1696 = vadd.xlane.f32.xlu0 %v5219_v0 }
 0x35f   : > { %4433 = vpow2.f32 %v1202_v46  ;;  %v1646_v48 = vsub.f32 %v5078_v14, %v1625_v59 }
 0x360   : > { %v5225_v32 = vpop.eup %4423  ;;  %v1674_v50 = vmul.f32 1.442695, %v1647_v51 }
 0x361   : > { %v5227_v33 = vpop.eup %4425  ;;  %v1672_v53 = vmul.f32 1.442695, %v1646_v48  ;;  %1232 = vadd.xlane.f32.xlu1 %v5225_v32  ;;  %v1161_v54 = vpop.xlane.xlu1 %1160 }
 0x362   : > { %4435 = vpow2.f32 %v1674_v50  ;;  %v1177_v28 = vsub.f32 %v5035_v56, %v1161_v54  ;;  %v1159_v55 = vpop.xlane.xlu0 %1158  ;;  %1230 = vadd.xlane.f32.xlu0 %v5227_v33  ;;  %v719_v50 = vld [vmem:[%s5881_s5 + $0x40] sm:$0xff]  ;;  %v721_v54 = vld [vmem:[%s5881_s5 + $0x50] sm:$0xff] }
 0x363   : > { %4437 = vpow2.f32 %v1672_v53  ;;  %v1176_v11 = vsub.f32 %v5037_v58, %v1159_v55  ;;  %3709 = vmatprep.mubr.f32.mxu0 %v719_v50  ;;  %v720_v53 = vld [vmem:[%s5881_s5 + $0x48] sm:$0xff]  ;;  %v723_v55 = vld [vmem:[%s5881_s5 + $0x60] sm:$0xff] }
 0x364   : > { %v5233_v1 = vpop.eup %4427  ;;  %v1208_v14 = vmul.f32 1.442695, %v1177_v28  ;;  %3710 = vmatmul.mubr.f32.gmra.mrb[24].mxu0 %v720_v53  ;;  %v722_v28 = vld [vmem:[%s5881_s5 + $0x58] sm:$0xff]  ;;  %v896_v53 = vmul.f32 0.17677669, %v5147_v27 }
 0x365   : > { %v5235_v4 = vpop.eup %4429  ;;  %v1206_v61 = vmul.f32 1.442695, %v1176_v11  ;;  %1702 = vadd.xlane.f32.xlu1 %v5233_v1  ;;  %v1631_v19 = vpop.xlane.xlu1 %1630  ;;  %3712 = vmatprep.mubr.f32.mxu0 %v721_v54  ;;  %v724_v11 = vld [vmem:[%s5881_s5 + $0x68] sm:$0xff]  ;;  %v897_v27 = vmul.f32 0.17677669, %v5145_v26 }
 0x366   : > { %4439 = vpow2.f32 %v1208_v14  ;;  %v1649_v62 = vsub.f32 %v5081_v16, %v1631_v19  ;;  %v1629_v22 = vpop.xlane.xlu0 %1628  ;;  %1700 = vadd.xlane.f32.xlu0 %v5235_v4  ;;  %v725_v14 = vld [vmem:[%s5881_s5 + $0x70] sm:$0xff]  ;;  %v5297_v19 = vpop.f32.mrb[16].mxu0  ;;  %v899_v26 = vmul.f32 0.17677669, %v5149_v7 }
 0x367   : > { %4441 = vpow2.f32 %v1206_v61  ;;  %v1648_v56 = vsub.f32 %v5084_v17, %v1629_v22  ;;  %v726_v61 = vld [vmem:[%s5881_s5 + $0x78] sm:$0xff]  ;;  %v809_v22 = vpop.f32.mrb[17].mxu0 }
 0x368   : > { %v5241_v34 = vpop.eup %4431  ;;  %v1678_v58 = vmul.f32 1.442695, %v1649_v62  ;;  %3713 = vmatmul.mubr.f32.gmra.mrb[26].mxu0 %v722_v28 }
 0x369   : > { %v5243_v35 = vpop.eup %4433  ;;  %v1676_v37 = vmul.f32 1.442695, %v1648_v56  ;;  %1236 = vadd.xlane.f32.xlu1 %v5241_v34  ;;  %v1635_v39 = vpop.xlane.xlu1 %1634  ;;  %3715 = vmatprep.mubr.f32.mxu0 %v723_v55 }
 0x36a   : > { %4443 = vpow2.f32 %v1678_v58  ;;  %v1651_v40 = vsub.f32 %v5093_v20, %v1635_v39  ;;  %v1633_v42 = vpop.xlane.xlu0 %1632  ;;  %1234 = vadd.xlane.f32.xlu0 %v5243_v35  ;;  %v5300_v58 = vpop.f32.mrb[18].mxu0 }
 0x36b   : > { %4445 = vpow2.f32 %v1676_v37  ;;  %v1650_v16 = vsub.f32 %v5096_v21, %v1633_v42  ;;  %v5304_v39 = vpop.f32.mrb[19].mxu0 }
 0x36c   : > { %v5249_v6 = vpop.eup %4435  ;;  %v1682_v17 = vmul.f32 1.442695, %v1651_v40  ;;  %3716 = vmatmul.mubr.f32.gmra.mrb[28].mxu0 %v724_v11  ;;  %v5306_v42 = vpop.f32.mrb[20].mxu0  ;;  %v898_v11 = vmul.f32 0.17677669, %v5151_v8 }
 0x36d   : > { %v5251_v9 = vpop.eup %4437  ;;  %v1680_v46 = vmul.f32 1.442695, %v1650_v16  ;;  %1706 = vadd.xlane.f32.xlu1 %v5249_v6  ;;  %3718 = vmatprep.mubr.f32.mxu0 %v725_v14  ;;  %v829_v50 = vpop.f32.mrb[21].mxu0  ;;  %v901_v14 = vmul.f32 0.17677669, %v5153_v10 }
 0x36e   : > { %4447 = vpow2.f32 %v1682_v17  ;;  %1704 = vadd.xlane.f32.xlu0 %v5251_v9  ;;  %3855 = vmatprep.mubr.f32.mxu1 %v829_v50  ;;  %v903_v8 = vmul.f32 0.17677669, %v5157_v13 }
 0x36f   : > { %4449 = vpow2.f32 %v1680_v46 }
 0x370   : > { %v5255_v49 = vpop.eup %4439  ;;  %3719 = vmatmul.mubr.f32.gmra.mrb[30].mxu0 %v726_v61 }
 0x371   : > { %v5257_v20 = vpop.eup %4441  ;;  %1240 = vadd.xlane.f32.xlu1 %v5255_v49  ;;  %3785 = vmatprep.mubr.f32.mxu0 %v809_v22  ;;  %v5322_v22 = vpop.f32.mrb[22].mxu0 }
 0x372   : > { %1238 = vadd.xlane.f32.xlu0 %v5257_v20 }
 0x374   : > { %v5261_v21 = vpop.eup %4443 }
 0x375   : > { %v5263_v51 = vpop.eup %4445  ;;  %1710 = vadd.xlane.f32.xlu1 %v5261_v21 }
 0x376   : > { %1708 = vadd.xlane.f32.xlu0 %v5263_v51 }
 0x378   : > { %v5267_v59 = vpop.eup %4447 }
 0x379   : > { %v5269_v48 = vpop.eup %4449  ;;  %1714 = vadd.xlane.f32.xlu1 %v5267_v59 }
 0x37a   : > { %1712 = vadd.xlane.f32.xlu0 %v5269_v48 }
 0x396   : > { %v1213_v62 = vpop.xlane.xlu1 %1212 }
 0x397   : > { %4451 = vrcp.f32 %v1213_v62  ;;  %v1211_v56 = vpop.xlane.xlu0 %1210 }
 0x398   : > { %4453 = vrcp.f32 %v1211_v56  ;;  %v5324_v56 = vpop.f32.mrb[23].mxu0 }
 0x39e   : > { %v1217_v37 = vpop.xlane.xlu1 %1216 }
 0x39f   : > { %4455 = vrcp.f32 %v1217_v37 }
 0x3a1   : > { %v4452_v40 = vpop.eup %4451 }
 0x3a2   : > { %v4454_v16 = vpop.eup %4453  ;;  %v1215_v17 = vpop.xlane.xlu0 %1214  ;;  %v1259_v46 = vmul.f32 %v4452_v40, %v5133_v2  ;;  %v900_v2 = vmul.f32 0.17677669, %v5155_v12 }
 0x3a3   : > { %4457 = vrcp.f32 %v1215_v17  ;;  %v1258_v54 = vmul.f32 %v4454_v16, %v5135_v5 }
 0x3a4   : > { %1275 = vst [vmem:[%s5311_s17 + $0x8] sm:$0xff] %v1259_v46 }
 0x3a5   : > { %1274 = vst [vmem:[%s5311_s17] sm:$0xff] %v1258_v54  ;;  %v4161_v28 = vpack.c.bf16 %v1259_v46, %v1258_v54 }
 0x3a7   : > { %4162 = vmatprep.subr.bf16.mxu0 %v4161_v28  ;;  %1854 = vxpose.xlu0.b32.start [1/4] (short) %v896_v53, 128 }
 0x3a8   : > { %4164 = vmatpush3.bf16.xpose.msra.mxu0 %v4161_v28 }
 0x3a9   : > { %v4456_v55 = vpop.eup %4455 }
 0x3aa   : > { %v1261_v5 = vmul.f32 %v4456_v55, %v5139_v24  ;;  %v902_v24 = vmul.f32 0.17677669, %v5159_v15 }
 0x3ab   : > { %1855 = vxpose.xlu0.b32.cont [2/4] (short) %v897_v27, 128 }
 0x3ac   : > { %2329 = vxpose.xlu1.b32.start [1/4] (short) %v900_v2, 128  ;;  %1277 = vst [vmem:[%s5311_s17 + $0x18] sm:$0xff] %v1261_v5 }
 0x3ad   : > { %v4458_v61 = vpop.eup %4457 }
 0x3ae   : > { %v1260_v62 = vmul.f32 %v4458_v61, %v5142_v25 }
 0x3af   : > { %1856 = vxpose.xlu0.b32.cont [3/4] (short) %v898_v11, 128 }
 0x3b0   : > { %1276 = vst [vmem:[%s5311_s17 + $0x10] sm:$0xff] %v1260_v62  ;;  %v4165_v12 = vpack.c.bf16 %v1261_v5, %v1260_v62  ;;  %2330 = vxpose.xlu1.b32.cont [2/4] (short) %v901_v14, 128 }
 0x3b2   : > { %4166 = vmatprep.subr.bf16.mxu0 %v4165_v12 }
 0x3b3   : > { %4168 = vmatpush3.bf16.xpose.msra.mxu0 %v4165_v12  ;;  %1857 = vxpose.xlu0.b32.end [4/4] (short) %v899_v26, 128 }
 0x3b4   : > { %2331 = vxpose.xlu1.b32.cont [3/4] (short) %v902_v24, 128 }
 0x3b8   : > { %2332 = vxpose.xlu1.b32.end [4/4] (short) %v903_v8, 128 }
 0x3d2   : > { %v1687_v25 = vpop.xlane.xlu1 %1686 }
 0x3d3   : > { %4459 = vrcp.f32 %v1687_v25  ;;  %v1685_v10 = vpop.xlane.xlu0 %1684 }
 0x3d4   : > { %4461 = vrcp.f32 %v1685_v10 }
 0x3d6   : > { %v1221_v37 = vpop.xlane.xlu1 %1220 }
 0x3d7   : > { %4463 = vrcp.f32 %v1221_v37  ;;  %v1219_v40 = vpop.xlane.xlu0 %1218 }
 0x3d8   : > { %4465 = vrcp.f32 %v1219_v40 }
 0x3da   : > { %v1691_v15 = vpop.xlane.xlu1 %1690 }
 0x3db   : > { %4467 = vrcp.f32 %v1691_v15  ;;  %v1689_v7 = vpop.xlane.xlu0 %1688 }
 0x3dc   : > { %4469 = vrcp.f32 %v1689_v7 }
 0x3dd   : > { %v4460_v16 = vpop.eup %4459 }
 0x3de   : > { %v4462_v17 = vpop.eup %4461  ;;  %v1225_v46 = vpop.xlane.xlu1 %1224  ;;  %v1733_v13 = vmul.f32 %v4460_v16, %v5169_v57 }
 0x3df   : > { %4471 = vrcp.f32 %v1225_v46  ;;  %v1223_v50 = vpop.xlane.xlu0 %1222  ;;  %v1732_v53 = vmul.f32 %v4462_v17, %v5171_v18 }
 0x3e0   : > { %4473 = vrcp.f32 %v1223_v50  ;;  %3176 = vst [vmem:[%s5311_s17 + $0x88] sm:$0xff] %v1733_v13 }
 0x3e1   : > { %v4464_v54 = vpop.eup %4463  ;;  %3175 = vst [vmem:[%s5311_s17 + $0x80] sm:$0xff] %v1732_v53  ;;  %v4201_v28 = vpack.c.bf16 %v1733_v13, %v1732_v53 }
 0x3e2   : > { %v4466_v2 = vpop.eup %4465  ;;  %v1695_v55 = vpop.xlane.xlu1 %1694  ;;  %v1263_v27 = vmul.f32 %v4464_v54, %v5177_v23 }
 0x3e3   : > { %4475 = vrcp.f32 %v1695_v55  ;;  %v1693_v5 = vpop.xlane.xlu0 %1692  ;;  %4202 = vmatprep.subr.bf16.mxu1 %v4201_v28  ;;  %v1262_v57 = vmul.f32 %v4466_v2, %v5179_v36 }
 0x3e4   : > { %4477 = vrcp.f32 %v1693_v5  ;;  %4204 = vmatpush3.bf16.xpose.msra.mxu1 %v4201_v28  ;;  %1279 = vst [vmem:[%s5311_s17 + $0x28] sm:$0xff] %v1263_v27 }
 0x3e5   : > { %v4468_v18 = vpop.eup %4467  ;;  %1278 = vst [vmem:[%s5311_s17 + $0x20] sm:$0xff] %v1262_v57  ;;  %v4169_v11 = vpack.c.bf16 %v1263_v27, %v1262_v57 }
 0x3e6   : > { %v4470_v14 = vpop.eup %4469  ;;  %v1229_v61 = vpop.xlane.xlu1 %1228  ;;  %v1735_v62 = vmul.f32 %v4468_v18, %v5185_v43 }
 0x3e7   : > { %4479 = vrcp.f32 %v1229_v61  ;;  %v1227_v12 = vpop.xlane.xlu0 %1226  ;;  %4170 = vmatprep.subr.bf16.mxu0 %v4169_v11  ;;  %v1734_v23 = vmul.f32 %v4470_v14, %v5187_v45 }
 0x3e8   : > { %4481 = vrcp.f32 %v1227_v12  ;;  %4172 = vmatpush3.bf16.xpose.msra.mxu0 %v4169_v11  ;;  %3178 = vst [vmem:[%s5311_s17 + $0x98] sm:$0xff] %v1735_v62 }
 0x3e9   : > { %v4472_v36 = vpop.eup %4471  ;;  %3177 = vst [vmem:[%s5311_s17 + $0x90] sm:$0xff] %v1734_v23  ;;  %v4205_v24 = vpack.c.bf16 %v1735_v62, %v1734_v23 }
 0x3ea   : > { %v4474_v26 = vpop.eup %4473  ;;  %v1699_v8 = vpop.xlane.xlu1 %1698  ;;  %v1265_v25 = vmul.f32 %v4472_v36, %v5193_v60 }
 0x3eb   : > { %4483 = vrcp.f32 %v1699_v8  ;;  %v1697_v10 = vpop.xlane.xlu0 %1696  ;;  %4206 = vmatprep.subr.bf16.mxu1 %v4205_v24  ;;  %v1264_v43 = vmul.f32 %v4474_v26, %v5195_v52 }
 0x3ec   : > { %4485 = vrcp.f32 %v1697_v10  ;;  %4208 = vmatpush3.bf16.xpose.msra.mxu1 %v4205_v24  ;;  %1281 = vst [vmem:[%s5311_s17 + $0x38] sm:$0xff] %v1265_v25 }
 0x3ed   : > { %v4476_v45 = vpop.eup %4475  ;;  %1280 = vst [vmem:[%s5311_s17 + $0x30] sm:$0xff] %v1264_v43  ;;  %v4173_v37 = vpack.c.bf16 %v1265_v25, %v1264_v43 }
 0x3ee   : > { %v4478_v40 = vpop.eup %4477  ;;  %v1233_v15 = vpop.xlane.xlu1 %1232  ;;  %v1737_v7 = vmul.f32 %v4476_v45, %v5201_v29 }
 0x3ef   : > { %4487 = vrcp.f32 %v1233_v15  ;;  %v1231_v16 = vpop.xlane.xlu0 %1230  ;;  %4174 = vmatprep.subr.bf16.mxu0 %v4173_v37  ;;  %v1736_v60 = vmul.f32 %v4478_v40, %v5203_v3 }
 0x3f0   : > { %4489 = vrcp.f32 %v1231_v16  ;;  %4176 = vmatpush3.bf16.xpose.msra.mxu0 %v4173_v37  ;;  %3180 = vst [vmem:[%s5311_s17 + $0xa8] sm:$0xff] %v1737_v7 }
 0x3f1   : > { %v4480_v52 = vpop.eup %4479  ;;  %3179 = vst [vmem:[%s5311_s17 + $0xa0] sm:$0xff] %v1736_v60  ;;  %v4209_v17 = vpack.c.bf16 %v1737_v7, %v1736_v60 }
 0x3f2   : > { %v4482_v46 = vpop.eup %4481  ;;  %v1703_v13 = vpop.xlane.xlu1 %1702  ;;  %v1267_v50 = vmul.f32 %v4480_v52, %v5209_v30 }
 0x3f3   : > { %4491 = vrcp.f32 %v1703_v13  ;;  %v1701_v53 = vpop.xlane.xlu0 %1700  ;;  %4210 = vmatprep.subr.bf16.mxu1 %v4209_v17  ;;  %v1266_v29 = vmul.f32 %v4482_v46, %v5211_v31 }
 0x3f4   : > { %4493 = vrcp.f32 %v1701_v53  ;;  %4212 = vmatpush3.bf16.xpose.msra.mxu1 %v4209_v17  ;;  %1283 = vst [vmem:[%s5311_s17 + $0x48] sm:$0xff] %v1267_v50 }
 0x3f5   : > { %v4484_v3 = vpop.eup %4483  ;;  %1282 = vst [vmem:[%s5311_s17 + $0x40] sm:$0xff] %v1266_v29  ;;  %v4177_v54 = vpack.c.bf16 %v1267_v50, %v1266_v29 }
 0x3f6   : > { %v4486_v28 = vpop.eup %4485  ;;  %v1237_v2 = vpop.xlane.xlu1 %1236  ;;  %v1739_v55 = vmul.f32 %v4484_v3, %v5217_v63 }
 0x3f7   : > { %4495 = vrcp.f32 %v1237_v2  ;;  %v1235_v27 = vpop.xlane.xlu0 %1234  ;;  %4178 = vmatprep.subr.bf16.mxu0 %v4177_v54  ;;  %v1738_v30 = vmul.f32 %v4486_v28, %v5219_v0 }
 0x3f8   : > { %4497 = vrcp.f32 %v1235_v27  ;;  %4180 = vmatpush3.bf16.xpose.msra.mxu0 %v4177_v54  ;;  %3182 = vst [vmem:[%s5311_s17 + $0xb8] sm:$0xff] %v1739_v55 }
 0x3f9   : > { %v4488_v31 = vpop.eup %4487  ;;  %3181 = vst [vmem:[%s5311_s17 + $0xb0] sm:$0xff] %v1738_v30  ;;  %v4213_v5 = vpack.c.bf16 %v1739_v55, %v1738_v30 }
 0x3fa   : > { %v4490_v57 = vpop.eup %4489  ;;  %v1707_v18 = vpop.xlane.xlu1 %1706  ;;  %v1269_v11 = vmul.f32 %v4488_v31, %v5225_v32 }
 0x3fb   : > { %4499 = vrcp.f32 %v1707_v18  ;;  %v1705_v14 = vpop.xlane.xlu0 %1704  ;;  %4214 = vmatprep.subr.bf16.mxu1 %v4213_v5  ;;  %v1268_v63 = vmul.f32 %v4490_v57, %v5227_v33 }
 0x3fc   : > { %4501 = vrcp.f32 %v1705_v14  ;;  %4216 = vmatpush3.bf16.xpose.msra.mxu1 %v4213_v5  ;;  %1285 = vst [vmem:[%s5311_s17 + $0x58] sm:$0xff] %v1269_v11 }
 0x3fd   : > { %v4492_v0 = vpop.eup %4491  ;;  %1284 = vst [vmem:[%s5311_s17 + $0x50] sm:$0xff] %v1268_v63  ;;  %v4181_v61 = vpack.c.bf16 %v1269_v11, %v1268_v63 }
 0x3fe   : > { %v4494_v62 = vpop.eup %4493  ;;  %v1241_v12 = vpop.xlane.xlu1 %1240  ;;  %v1741_v23 = vmul.f32 %v4492_v0, %v5233_v1 }
 0x3ff   : > { %4503 = vrcp.f32 %v1241_v12  ;;  %v1239_v36 = vpop.xlane.xlu0 %1238  ;;  %4182 = vmatprep.subr.bf16.mxu0 %v4181_v61  ;;  %v1740_v32 = vmul.f32 %v4494_v62, %v5235_v4 }
 0x400   : > { %4505 = vrcp.f32 %v1239_v36  ;;  %4184 = vmatpush3.bf16.xpose.msra.mxu0 %v4181_v61  ;;  %3184 = vst [vmem:[%s5311_s17 + $0xc8] sm:$0xff] %v1741_v23 }
 0x401   : > { %v4496_v33 = vpop.eup %4495  ;;  %3183 = vst [vmem:[%s5311_s17 + $0xc0] sm:$0xff] %v1740_v32  ;;  %v4217_v24 = vpack.c.bf16 %v1741_v23, %v1740_v32 }
 0x402   : > { %v4498_v26 = vpop.eup %4497  ;;  %v1711_v8 = vpop.xlane.xlu1 %1710  ;;  %v1271_v25 = vmul.f32 %v4496_v33, %v5241_v34 }
 0x403   : > { %4507 = vrcp.f32 %v1711_v8  ;;  %v1709_v10 = vpop.xlane.xlu0 %1708  ;;  %4218 = vmatprep.subr.bf16.mxu1 %v4217_v24  ;;  %v1270_v1 = vmul.f32 %v4498_v26, %v5243_v35 }
 0x404   : > { %4509 = vrcp.f32 %v1709_v10  ;;  %4220 = vmatpush3.bf16.xpose.msra.mxu1 %v4217_v24  ;;  %1287 = vst [vmem:[%s5311_s17 + $0x68] sm:$0xff] %v1271_v25 }
 0x405   : > { %v4500_v4 = vpop.eup %4499  ;;  %1286 = vst [vmem:[%s5311_s17 + $0x60] sm:$0xff] %v1270_v1  ;;  %v4185_v43 = vpack.c.bf16 %v1271_v25, %v1270_v1 }
 0x406   : > { %v4502_v45 = vpop.eup %4501  ;;  %v1715_v37 = vpop.xlane.xlu1 %1714  ;;  %v1743_v40 = vmul.f32 %v4500_v4, %v5249_v6 }
 0x407   : > { %4511 = vrcp.f32 %v1715_v37  ;;  %v1713_v34 = vpop.xlane.xlu0 %1712  ;;  %4186 = vmatprep.subr.bf16.mxu0 %v4185_v43  ;;  %v1742_v15 = vmul.f32 %v4502_v45, %v5251_v9 }
 0x408   : > { %4513 = vrcp.f32 %v1713_v34  ;;  %4188 = vmatpush3.bf16.xpose.msra.mxu0 %v4185_v43  ;;  %3186 = vst [vmem:[%s5311_s17 + $0xd8] sm:$0xff] %v1743_v40 }
 0x409   : > { %v4504_v35 = vpop.eup %4503  ;;  %3185 = vst [vmem:[%s5311_s17 + $0xd0] sm:$0xff] %v1742_v15  ;;  %v4221_v7 = vpack.c.bf16 %v1743_v40, %v1742_v15 }
 0x40a   : > { %v4506_v16 = vpop.eup %4505  ;;  %v1273_v60 = vmul.f32 %v4504_v35, %v5255_v49 }
 0x40b   : > { %4222 = vmatprep.subr.bf16.mxu1 %v4221_v7  ;;  %v1272_v6 = vmul.f32 %v4506_v16, %v5257_v20 }
 0x40c   : > { %4224 = vmatpush3.bf16.xpose.msra.mxu1 %v4221_v7  ;;  %1289 = vst [vmem:[%s5311_s17 + $0x78] sm:$0xff] %v1273_v60 }
 0x40d   : > { %v4508_v52 = vpop.eup %4507  ;;  %1288 = vst [vmem:[%s5311_s17 + $0x70] sm:$0xff] %v1272_v6  ;;  %v4189_v17 = vpack.c.bf16 %v1273_v60, %v1272_v6 }
 0x40e   : > { %v4510_v9 = vpop.eup %4509  ;;  %v1745_v46 = vmul.f32 %v4508_v52, %v5261_v21 }
 0x40f   : > { %4190 = vmatprep.subr.bf16.mxu0 %v4189_v17  ;;  %v1744_v13 = vmul.f32 %v4510_v9, %v5263_v51 }
 0x410   : > { %4192 = vmatpush3.bf16.xpose.msra.mxu0 %v4189_v17  ;;  %3188 = vst [vmem:[%s5311_s17 + $0xe8] sm:$0xff] %v1745_v46 }
 0x411   : > { %v4512_v49 = vpop.eup %4511  ;;  %4234 = vmatprep.subr.bf16.mxu0 %v4923_v38  ;;  %3187 = vst [vmem:[%s5311_s17 + $0xe0] sm:$0xff] %v1744_v13  ;;  %v4225_v20 = vpack.c.bf16 %v1745_v46, %v1744_v13 }
 0x412   : > { %v4514_v50 = vpop.eup %4513  ;;  %v1747_v53 = vmul.f32 %v4512_v49, %v5267_v59 }
 0x413   : > { %4226 = vmatprep.subr.bf16.mxu1 %v4225_v20  ;;  %v1746_v29 = vmul.f32 %v4514_v50, %v5269_v48 }
 0x414   : > { %4228 = vmatpush3.bf16.xpose.msra.mxu1 %v4225_v20  ;;  %3190 = vst [vmem:[%s5311_s17 + $0xf8] sm:$0xff] %v1747_v53 }
 0x415   : > { %3189 = vst [vmem:[%s5311_s17 + $0xf0] sm:$0xff] %v1746_v29  ;;  %v4229_v21 = vpack.c.bf16 %v1747_v53, %v1746_v29 }
 0x417   : > { %4230 = vmatprep.subr.bf16.mxu1 %v4229_v21  ;;  %3786 = vmatmul.mubr.f32.vlgmr.msra.gmra.mrb[32].mxu0 %v5297_v19 }
 0x418   : > { %4236 = vmatpush3.bf16.msra.mxu0 %v4923_v38  ;;  %3788 = vmatprep.mubr.f32.mxu0 %v5304_v39 }
 0x419   : > { %4238 = vmatprep.subr.bf16.mxu0 %v4925_v41 }
 0x41b   : > { %3789 = vmatmul.mubr.f32.gmra.mrb[34].mxu0 %v5300_v58 }
 0x41c   : > { %4232 = vmatpush3.bf16.xpose.msra.mxu1 %v4229_v21  ;;  %4240 = vmatpush3.bf16.msra.mxu0 %v4925_v41 }
 0x41d   : > { %4274 = vmatprep.subr.bf16.mxu1 %v4927_v44 }
 0x423   : > { %3856 = vmatmul.mubr.f32.vlgmr.msra.gmra.mrb[48].mxu1 %v5306_v42 }
 0x424   : > { %4276 = vmatpush3.bf16.msra.mxu1 %v4927_v44  ;;  %3858 = vmatprep.mubr.f32.mxu1 %v5324_v56 }
 0x425   : > { %4278 = vmatprep.subr.bf16.mxu1 %v4929_v47 }
 0x427   : > { %v1870_v38 = vpop.trf.xlu0  ;;  %3859 = vmatmul.mubr.f32.gmra.mrb[50].mxu1 %v5322_v22 }
 0x428   : > { %3869 = vmatprep.mubr.msk.f32.mxu0 %vm936_vm0, %v1870_v38  ;;  %4280 = vmatpush3.bf16.msra.mxu1 %v4929_v47 }
 0x42b   : > { %v1871_v51 = vpop.trf.xlu0 }
 0x42c   : > { %3870 = vmatmul.mubr.msk.f32.vlgmr.msra.gmra.mrb[36].mxu0 %vm936_vm0, %v1871_v51  ;;  %v2345_v41 = vpop.trf.xlu1 }
 0x42d   : > { %3939 = vmatprep.mubr.msk.f32.mxu1 %vm936_vm0, %v2345_v41 }
 0x42f   : > { %v1872_v59 = vpop.trf.xlu0 }
 0x430   : > { %3872 = vmatprep.mubr.msk.f32.mxu0 %vm936_vm0, %v1872_v59  ;;  %v2346_v44 = vpop.trf.xlu1 }
 0x431   : > { %3940 = vmatmul.mubr.msk.f32.vlgmr.msra.gmra.mrb[52].mxu1 %vm936_vm0, %v2346_v44 }
 0x433   : > { %v1873_v48 = vpop.trf.xlu0 }
 0x434   : > { %3873 = vmatmul.mubr.msk.f32.gmra.mrb[38].mxu0 %vm936_vm0, %v1873_v48  ;;  %v2347_v19 = vpop.trf.xlu1 }
 0x435   : > { %3942 = vmatprep.mubr.msk.f32.mxu1 %vm936_vm0, %v2347_v19 }
 0x437   : > { %v1874_v58 = vpop.trf.xlu0  ;;  %v5425_v63 = vpop.f32.mrb[24].mxu0 }
 0x438   : > { %3875 = vmatprep.mubr.msk.f32.mxu0 %vm936_vm0, %v1874_v58  ;;  %v2348_v47 = vpop.trf.xlu1  ;;  %v849_v61 = vpop.f32.mrb[25].mxu0 }
 0x439   : > { %3943 = vmatmul.mubr.msk.f32.gmra.mrb[54].mxu1 %vm936_vm0, %v2348_v47 }
 0x43b   : > { %v1875_v39 = vpop.trf.xlu0  ;;  %v5429_v12 = vpop.f32.mrb[26].mxu0 }
 0x43c   : > { %3876 = vmatmul.mubr.msk.f32.gmra.mrb[40].mxu0 %vm936_vm0, %v1875_v39  ;;  %v2349_v42 = vpop.trf.xlu1  ;;  %v5432_v36 = vpop.f32.mrb[27].mxu0 }
 0x43d   : > { %3945 = vmatprep.mubr.msk.f32.mxu1 %vm936_vm0, %v2349_v42 }
 0x43f   : > { %v1876_v22 = vpop.trf.xlu0  ;;  %v5435_v33 = vpop.f32.mrb[28].mxu0 }
 0x440   : > { %3878 = vmatprep.mubr.msk.f32.mxu0 %vm936_vm0, %v1876_v22  ;;  %v2350_v56 = vpop.trf.xlu1  ;;  %v869_v26 = vpop.f32.mrb[29].mxu0 }
 0x441   : > { %3946 = vmatmul.mubr.msk.f32.gmra.mrb[56].mxu1 %vm936_vm0, %v2350_v56 }
 0x443   : > { %v1877_v3 = vpop.trf.xlu0  ;;  %v5439_v8 = vpop.f32.mrb[30].mxu0 }
 0x444   : > { %3879 = vmatmul.mubr.msk.f32.gmra.mrb[42].mxu0 %vm936_vm0, %v1877_v3  ;;  %v2351_v54 = vpop.trf.xlu1  ;;  %v5441_v10 = vpop.f32.mrb[31].mxu0 }
 0x445   : > { %3948 = vmatprep.mubr.msk.f32.mxu1 %vm936_vm0, %v2351_v54 }
 0x447   : > { %v1878_v28 = vpop.trf.xlu0 }
 0x448   : > { %3881 = vmatprep.mubr.msk.f32.mxu0 %vm936_vm0, %v1878_v28  ;;  %v2352_v2 = vpop.trf.xlu1 }
 0x449   : > { %3949 = vmatmul.mubr.msk.f32.gmra.mrb[58].mxu1 %vm936_vm0, %v2352_v2 }
 0x44b   : > { %v1879_v55 = vpop.trf.xlu0 }
 0x44c   : > { %3882 = vmatmul.mubr.msk.f32.gmra.mrb[44].mxu0 %vm936_vm0, %v1879_v55  ;;  %v2353_v27 = vpop.trf.xlu1 }
 0x44d   : > { %3951 = vmatprep.mubr.msk.f32.mxu1 %vm936_vm0, %v2353_v27 }
 0x44f   : > { %v1880_v30 = vpop.trf.xlu0 }
 0x450   : > { %3884 = vmatprep.mubr.msk.f32.mxu0 %vm936_vm0, %v1880_v30  ;;  %v2354_v31 = vpop.trf.xlu1 }
 0x451   : > { %3952 = vmatmul.mubr.msk.f32.gmra.mrb[60].mxu1 %vm936_vm0, %v2354_v31 }
 0x453   : > { %v1881_v5 = vpop.trf.xlu0 }
 0x454   : > { %3885 = vmatmul.mubr.msk.f32.gmra.mrb[46].mxu0 %vm936_vm0, %v1881_v5  ;;  %v2355_v57 = vpop.trf.xlu1 }
 0x455   : > { %3954 = vmatprep.mubr.msk.f32.mxu1 %vm936_vm0, %v2355_v57 }
 0x457   : > { %v1882_v18 = vpop.trf.xlu0 }
 0x458   : > { %3887 = vmatprep.mubr.msk.f32.mxu0 %vm936_vm0, %v1882_v18  ;;  %v2356_v11 = vpop.trf.xlu1 }
 0x459   : > { %3955 = vmatmul.mubr.msk.f32.gmra.mrb[62].mxu1 %vm936_vm0, %v2356_v11 }
 0x45b   : > { %v1883_v14 = vpop.trf.xlu0 }
 0x45c   : > { %3888 = vmatmul.mubr.msk.f32.gmra.mrb[48].mxu0 %vm936_vm0, %v1883_v14  ;;  %v2357_v0 = vpop.trf.xlu1 }
 0x45d   : > { %3957 = vmatprep.mubr.msk.f32.mxu1 %vm936_vm0, %v2357_v0 }
 0x45f   : > { %v1884_v62 = vpop.trf.xlu0 }
 0x460   : > { %3890 = vmatprep.mubr.msk.f32.mxu0 %vm936_vm0, %v1884_v62  ;;  %v2358_v23 = vpop.trf.xlu1 }
 0x461   : > { %3958 = vmatmul.mubr.msk.f32.gmra.mrb[64].mxu1 %vm936_vm0, %v2358_v23 }
 0x463   : > { %v1885_v32 = vpop.trf.xlu0 }
 0x464   : > { %3891 = vmatmul.mubr.msk.f32.gmra.mrb[50].mxu0 %vm936_vm0, %v1885_v32  ;;  %v2359_v24 = vpop.trf.xlu1 }
 0x465   : > { %3960 = vmatprep.mubr.msk.f32.mxu1 %vm936_vm0, %v2359_v24  ;;  %3925 = vmatprep.mubr.f32.mxu0 %v849_v61 }
 0x468   : > { %v2360_v25 = vpop.trf.xlu1 }
 0x469   : > { %3961 = vmatmul.mubr.msk.f32.gmra.mrb[66].mxu1 %vm936_vm0, %v2360_v25 }
 0x46a   : > { %3995 = vmatprep.mubr.f32.mxu1 %v869_v26 }
 0x4ea   : > { %v3787_v1 = vpop.f32.mrb[32].mxu0 }
 0x4eb   : > { %v1356_v4 = vpop.f32.mrb[33].mxu0 }
 0x4ec   : > { %v5444_v43 = vpack.c.bf16 %v3787_v1, %v1356_v4 }
 0x4ee   : > { %v3790_v45 = vpop.f32.mrb[34].mxu0 }
 0x4ef   : > { %v1366_v37 = vpop.f32.mrb[35].mxu0 }
 0x4f0   : > { %v5446_v40 = vpack.c.bf16 %v3790_v45, %v1366_v37 }
 0x4f6   : > { %v3857_v34 = vpop.f32.mrb[48].mxu1 }
 0x4f7   : > { %v1831_v15 = vpop.f32.mrb[49].mxu1 }
 0x4f8   : > { %v5448_v35 = vpack.c.bf16 %v3857_v34, %v1831_v15 }
 0x4fa   : > { %v3860_v7 = vpop.f32.mrb[50].mxu1 }
 0x4fb   : > { %v1841_v16 = vpop.f32.mrb[51].mxu1 }
 0x4fc   : > { %v5450_v60 = vpack.c.bf16 %v3860_v7, %v1841_v16 }
 0x4ff   : > { %v5452_v6 = vpop.f32.mrb[36].mxu0 }
 0x500   : > { %2081 = vmax.xlane.f32.xlu1 %v5452_v6  ;;  %v5455_v52 = vpop.f32.mrb[37].mxu0 }
 0x501   : > { %2079 = vmax.xlane.f32.xlu0 %v5455_v52 }
 0x504   : > { %v5458_v17 = vpop.f32.mrb[52].mxu1 }
 0x505   : > { %v5460_v9 = vpop.f32.mrb[53].mxu1 }
 0x507   : > { %v5462_v46 = vpop.f32.mrb[38].mxu0 }
 0x508   : > { %2085 = vmax.xlane.f32.xlu1 %v5462_v46  ;;  %v5465_v13 = vpop.f32.mrb[39].mxu0 }
 0x509   : > { %2083 = vmax.xlane.f32.xlu0 %v5465_v13 }
 0x50c   : > { %2556 = vmax.xlane.f32.xlu1 %v5458_v17  ;;  %v5469_v49 = vpop.f32.mrb[54].mxu1 }
 0x50d   : > { %2554 = vmax.xlane.f32.xlu0 %v5460_v9  ;;  %v5472_v20 = vpop.f32.mrb[55].mxu1 }
 0x50f   : > { %v5474_v50 = vpop.f32.mrb[40].mxu0 }
 0x510   : > { %2089 = vmax.xlane.f32.xlu1 %v5474_v50  ;;  %v5477_v53 = vpop.f32.mrb[41].mxu0 }
 0x511   : > { %2087 = vmax.xlane.f32.xlu0 %v5477_v53 }
 0x514   : > { %2560 = vmax.xlane.f32.xlu1 %v5469_v49  ;;  %v5481_v29 = vpop.f32.mrb[56].mxu1 }
 0x515   : > { %2558 = vmax.xlane.f32.xlu0 %v5472_v20  ;;  %v5484_v21 = vpop.f32.mrb[57].mxu1 }
 0x517   : > { %v5486_v38 = vpop.f32.mrb[42].mxu0 }
 0x518   : > { %2093 = vmax.xlane.f32.xlu1 %v5486_v38  ;;  %v5489_v51 = vpop.f32.mrb[43].mxu0 }
 0x519   : > { %2091 = vmax.xlane.f32.xlu0 %v5489_v51 }
 0x51c   : > { %2564 = vmax.xlane.f32.xlu1 %v5481_v29  ;;  %v5493_v41 = vpop.f32.mrb[58].mxu1 }
 0x51d   : > { %2562 = vmax.xlane.f32.xlu0 %v5484_v21  ;;  %v5496_v59 = vpop.f32.mrb[59].mxu1 }
 0x51f   : > { %v5498_v44 = vpop.f32.mrb[44].mxu0 }
 0x520   : > { %2097 = vmax.xlane.f32.xlu1 %v5498_v44  ;;  %v5501_v48 = vpop.f32.mrb[45].mxu0 }
 0x521   : > { %2095 = vmax.xlane.f32.xlu0 %v5501_v48 }
 0x524   : > { %2568 = vmax.xlane.f32.xlu1 %v5493_v41  ;;  %v5505_v19 = vpop.f32.mrb[60].mxu1 }
 0x525   : > { %2566 = vmax.xlane.f32.xlu0 %v5496_v59  ;;  %v5508_v58 = vpop.f32.mrb[61].mxu1 }
 0x527   : > { %v5510_v47 = vpop.f32.mrb[46].mxu0 }
 0x528   : > { %2101 = vmax.xlane.f32.xlu1 %v5510_v47  ;;  %v5513_v39 = vpop.f32.mrb[47].mxu0 }
 0x529   : > { %2099 = vmax.xlane.f32.xlu0 %v5513_v39 }
 0x52c   : > { %2572 = vmax.xlane.f32.xlu1 %v5505_v19  ;;  %v5517_v42 = vpop.f32.mrb[62].mxu1 }
 0x52d   : > { %2570 = vmax.xlane.f32.xlu0 %v5508_v58  ;;  %v5520_v22 = vpop.f32.mrb[63].mxu1 }
 0x52f   : > { %v5522_v56 = vpop.f32.mrb[48].mxu0 }
 0x530   : > { %2105 = vmax.xlane.f32.xlu1 %v5522_v56  ;;  %v5525_v3 = vpop.f32.mrb[49].mxu0 }
 0x531   : > { %2103 = vmax.xlane.f32.xlu0 %v5525_v3 }
 0x534   : > { %2576 = vmax.xlane.f32.xlu1 %v5517_v42  ;;  %v5529_v54 = vpop.f32.mrb[64].mxu1 }
 0x535   : > { %2574 = vmax.xlane.f32.xlu0 %v5520_v22  ;;  %v5532_v28 = vpop.f32.mrb[65].mxu1 }
 0x537   : > { %v5534_v2 = vpop.f32.mrb[50].mxu0 }
 0x538   : > { %2109 = vmax.xlane.f32.xlu1 %v5534_v2  ;;  %v5537_v55 = vpop.f32.mrb[51].mxu0 }
 0x539   : > { %2107 = vmax.xlane.f32.xlu0 %v5537_v55 }
 0x53c   : > { %2580 = vmax.xlane.f32.xlu1 %v5529_v54  ;;  %v5541_v27 = vpop.f32.mrb[66].mxu1 }
 0x53d   : > { %2578 = vmax.xlane.f32.xlu0 %v5532_v28  ;;  %v5544_v30 = vpop.f32.mrb[67].mxu1 }
 0x540   : > { %2584 = vmax.xlane.f32.xlu1 %v5541_v27 }
 0x541   : > { %2582 = vmax.xlane.f32.xlu0 %v5544_v30 }
 0x58d   : > { %v2082_v31 = vpop.xlane.xlu1 %2081 }
 0x58e   : > { %v2112_v5 = vsub.f32 %v5452_v6, %v2082_v31  ;;  %v2080_v57 = vpop.xlane.xlu0 %2079 }
 0x58f   : > { %v2111_v18 = vsub.f32 %v5455_v52, %v2080_v57 }
 0x590   : > { %v2129_v11 = vmul.f32 1.442695, %v2112_v5 }
 0x591   : > { %v2127_v14 = vmul.f32 1.442695, %v2111_v18 }
 0x592   : > { %4515 = vpow2.f32 %v2129_v11 }
 0x593   : > { %4517 = vpow2.f32 %v2127_v14 }
 0x595   : > { %v2086_v0 = vpop.xlane.xlu1 %2085 }
 0x596   : > { %v2114_v61 = vsub.f32 %v5462_v46, %v2086_v0  ;;  %v2084_v62 = vpop.xlane.xlu0 %2083 }
 0x597   : > { %v2113_v23 = vsub.f32 %v5465_v13, %v2084_v62 }
 0x598   : > { %v2133_v32 = vmul.f32 1.442695, %v2114_v61 }
 0x599   : > { %v2131_v24 = vmul.f32 1.442695, %v2113_v23  ;;  %v2557_v26 = vpop.xlane.xlu1 %2556 }
 0x59a   : > { %4519 = vpow2.f32 %v2133_v32  ;;  %v2587_v25 = vsub.f32 %v5458_v17, %v2557_v26  ;;  %v2555_v1 = vpop.xlane.xlu0 %2554 }
 0x59b   : > { %4521 = vpow2.f32 %v2131_v24  ;;  %v2586_v4 = vsub.f32 %v5460_v9, %v2555_v1 }
 0x59c   : > { %v5554_v45 = vpop.eup %4515  ;;  %v2604_v37 = vmul.f32 1.442695, %v2587_v25 }
 0x59d   : > { %v5556_v34 = vpop.eup %4517  ;;  %v2602_v15 = vmul.f32 1.442695, %v2586_v4  ;;  %v2090_v7 = vpop.xlane.xlu1 %2089  ;;  %2161 = vadd.xlane.f32.xlu1 %v5554_v45 }
 0x59e   : > { %4523 = vpow2.f32 %v2604_v37  ;;  %v2116_v16 = vsub.f32 %v5474_v50, %v2090_v7  ;;  %v2088_v6 = vpop.xlane.xlu0 %2087  ;;  %2159 = vadd.xlane.f32.xlu0 %v5556_v34 }
 0x59f   : > { %4525 = vpow2.f32 %v2602_v15  ;;  %v2115_v52 = vsub.f32 %v5477_v53, %v2088_v6 }
 0x5a0   : > { %v2137_v17 = vmul.f32 1.442695, %v2116_v16 }
 0x5a1   : > { %v2135_v9 = vmul.f32 1.442695, %v2115_v52  ;;  %v2561_v46 = vpop.xlane.xlu1 %2560 }
 0x5a2   : > { %4527 = vpow2.f32 %v2137_v17  ;;  %v2589_v13 = vsub.f32 %v5469_v49, %v2561_v46  ;;  %v2559_v31 = vpop.xlane.xlu0 %2558 }
 0x5a3   : > { %4529 = vpow2.f32 %v2135_v9  ;;  %v2588_v5 = vsub.f32 %v5472_v20, %v2559_v31 }
 0x5a4   : > { %v5564_v57 = vpop.eup %4519  ;;  %v2608_v18 = vmul.f32 1.442695, %v2589_v13 }
 0x5a5   : > { %v5566_v50 = vpop.eup %4521  ;;  %v2606_v11 = vmul.f32 1.442695, %v2588_v5  ;;  %v2094_v14 = vpop.xlane.xlu1 %2093  ;;  %2165 = vadd.xlane.f32.xlu1 %v5564_v57 }
 0x5a6   : > { %4531 = vpow2.f32 %v2608_v18  ;;  %v2118_v53 = vsub.f32 %v5486_v38, %v2094_v14  ;;  %v2092_v0 = vpop.xlane.xlu0 %2091  ;;  %2163 = vadd.xlane.f32.xlu0 %v5566_v50 }
 0x5a7   : > { %4533 = vpow2.f32 %v2606_v11  ;;  %v2117_v49 = vsub.f32 %v5489_v51, %v2092_v0 }
 0x5a8   : > { %v5572_v61 = vpop.eup %4523  ;;  %v2141_v20 = vmul.f32 1.442695, %v2118_v53 }
 0x5a9   : > { %v5574_v62 = vpop.eup %4525  ;;  %v2139_v23 = vmul.f32 1.442695, %v2117_v49  ;;  %v2565_v32 = vpop.xlane.xlu1 %2564  ;;  %2636 = vadd.xlane.f32.xlu1 %v5572_v61 }
 0x5aa   : > { %4535 = vpow2.f32 %v2141_v20  ;;  %v2591_v24 = vsub.f32 %v5481_v29, %v2565_v32  ;;  %v2563_v26 = vpop.xlane.xlu0 %2562  ;;  %2634 = vadd.xlane.f32.xlu0 %v5574_v62 }
 0x5ab   : > { %4537 = vpow2.f32 %v2139_v23  ;;  %v2590_v38 = vsub.f32 %v5484_v21, %v2563_v26 }
 0x5ac   : > { %v5580_v25 = vpop.eup %4527  ;;  %v2612_v51 = vmul.f32 1.442695, %v2591_v24 }
 0x5ad   : > { %v5582_v1 = vpop.eup %4529  ;;  %v2610_v4 = vmul.f32 1.442695, %v2590_v38  ;;  %v2098_v37 = vpop.xlane.xlu1 %2097  ;;  %2169 = vadd.xlane.f32.xlu1 %v5580_v25 }
 0x5ae   : > { %4539 = vpow2.f32 %v2612_v51  ;;  %v2120_v15 = vsub.f32 %v5498_v44, %v2098_v37  ;;  %v2096_v7 = vpop.xlane.xlu0 %2095  ;;  %2167 = vadd.xlane.f32.xlu0 %v5582_v1 }
 0x5af   : > { %4541 = vpow2.f32 %v2610_v4  ;;  %v2119_v29 = vsub.f32 %v5501_v48, %v2096_v7 }
 0x5b0   : > { %v5588_v16 = vpop.eup %4531  ;;  %v2145_v21 = vmul.f32 1.442695, %v2120_v15 }
 0x5b1   : > { %v5590_v6 = vpop.eup %4533  ;;  %v2143_v52 = vmul.f32 1.442695, %v2119_v29  ;;  %v2569_v17 = vpop.xlane.xlu1 %2568  ;;  %2640 = vadd.xlane.f32.xlu1 %v5588_v16 }
 0x5b2   : > { %4543 = vpow2.f32 %v2145_v21  ;;  %v2593_v9 = vsub.f32 %v5493_v41, %v2569_v17  ;;  %v2567_v46 = vpop.xlane.xlu0 %2566  ;;  %2638 = vadd.xlane.f32.xlu0 %v5590_v6 }
 0x5b3   : > { %4545 = vpow2.f32 %v2143_v52  ;;  %v2592_v44 = vsub.f32 %v5496_v59, %v2567_v46 }
 0x5b4   : > { %v5596_v13 = vpop.eup %4535  ;;  %v2616_v48 = vmul.f32 1.442695, %v2593_v9 }
 0x5b5   : > { %v5598_v31 = vpop.eup %4537  ;;  %v2614_v5 = vmul.f32 1.442695, %v2592_v44  ;;  %v2102_v18 = vpop.xlane.xlu1 %2101  ;;  %2173 = vadd.xlane.f32.xlu1 %v5596_v13 }
 0x5b6   : > { %4547 = vpow2.f32 %v2616_v48  ;;  %v2122_v11 = vsub.f32 %v5510_v47, %v2102_v18  ;;  %v2100_v14 = vpop.xlane.xlu0 %2099  ;;  %2171 = vadd.xlane.f32.xlu0 %v5598_v31 }
 0x5b7   : > { %4549 = vpow2.f32 %v2614_v5  ;;  %v2121_v41 = vsub.f32 %v5513_v39, %v2100_v14 }
 0x5b8   : > { %v5604_v53 = vpop.eup %4539  ;;  %v2149_v59 = vmul.f32 1.442695, %v2122_v11 }
 0x5b9   : > { %v5606_v0 = vpop.eup %4541  ;;  %v2147_v49 = vmul.f32 1.442695, %v2121_v41  ;;  %v2573_v20 = vpop.xlane.xlu1 %2572  ;;  %2644 = vadd.xlane.f32.xlu1 %v5604_v53 }
 0x5ba   : > { %4551 = vpow2.f32 %v2149_v59  ;;  %v2595_v23 = vsub.f32 %v5505_v19, %v2573_v20  ;;  %v2571_v32 = vpop.xlane.xlu0 %2570  ;;  %2642 = vadd.xlane.f32.xlu0 %v5606_v0 }
 0x5bb   : > { %4553 = vpow2.f32 %v2147_v49  ;;  %v2594_v47 = vsub.f32 %v5508_v58, %v2571_v32 }
 0x5bc   : > { %v5612_v24 = vpop.eup %4543  ;;  %v2620_v39 = vmul.f32 1.442695, %v2595_v23 }
 0x5bd   : > { %v5614_v26 = vpop.eup %4545  ;;  %v2618_v38 = vmul.f32 1.442695, %v2594_v47  ;;  %v2106_v51 = vpop.xlane.xlu1 %2105  ;;  %2177 = vadd.xlane.f32.xlu1 %v5612_v24 }
 0x5be   : > { %4555 = vpow2.f32 %v2620_v39  ;;  %v2124_v4 = vsub.f32 %v5522_v56, %v2106_v51  ;;  %v2104_v37 = vpop.xlane.xlu0 %2103  ;;  %2175 = vadd.xlane.f32.xlu0 %v5614_v26 }
 0x5bf   : > { %4557 = vpow2.f32 %v2618_v38  ;;  %v2123_v19 = vsub.f32 %v5525_v3, %v2104_v37 }
 0x5c0   : > { %v5620_v15 = vpop.eup %4547  ;;  %v2153_v58 = vmul.f32 1.442695, %v2124_v4 }
 0x5c1   : > { %v5622_v7 = vpop.eup %4549  ;;  %v2151_v29 = vmul.f32 1.442695, %v2123_v19  ;;  %v2577_v21 = vpop.xlane.xlu1 %2576  ;;  %2648 = vadd.xlane.f32.xlu1 %v5620_v15 }
 0x5c2   : > { %4559 = vpow2.f32 %v2153_v58  ;;  %v2597_v52 = vsub.f32 %v5517_v42, %v2577_v21  ;;  %v2575_v17 = vpop.xlane.xlu0 %2574  ;;  %2646 = vadd.xlane.f32.xlu0 %v5622_v7 }
 0x5c3   : > { %4561 = vpow2.f32 %v2151_v29  ;;  %v2596_v56 = vsub.f32 %v5520_v22, %v2575_v17 }
 0x5c4   : > { %v5628_v9 = vpop.eup %4551  ;;  %v2624_v3 = vmul.f32 1.442695, %v2597_v52 }
 0x5c5   : > { %v5630_v46 = vpop.eup %4553  ;;  %v2622_v44 = vmul.f32 1.442695, %v2596_v56  ;;  %2181 = vadd.xlane.f32.xlu1 %v5628_v9  ;;  %v2110_v48 = vpop.xlane.xlu1 %2109 }
 0x5c6   : > { %4563 = vpow2.f32 %v2624_v3  ;;  %v2126_v5 = vsub.f32 %v5534_v2, %v2110_v48  ;;  %2179 = vadd.xlane.f32.xlu0 %v5630_v46  ;;  %v2108_v42 = vpop.xlane.xlu0 %2107 }
 0x5c7   : > { %4565 = vpow2.f32 %v2622_v44  ;;  %v2125_v18 = vsub.f32 %v5537_v55, %v2108_v42 }
 0x5c8   : > { %v5636_v11 = vpop.eup %4555  ;;  %v2157_v22 = vmul.f32 1.442695, %v2126_v5 }
 0x5c9   : > { %v5638_v14 = vpop.eup %4557  ;;  %v2155_v41 = vmul.f32 1.442695, %v2125_v18  ;;  %2652 = vadd.xlane.f32.xlu1 %v5636_v11  ;;  %v2581_v59 = vpop.xlane.xlu1 %2580 }
 0x5ca   : > { %4567 = vpow2.f32 %v2157_v22  ;;  %v2599_v49 = vsub.f32 %v5529_v54, %v2581_v59  ;;  %2650 = vadd.xlane.f32.xlu0 %v5638_v14  ;;  %v2579_v2 = vpop.xlane.xlu0 %2578 }
 0x5cb   : > { %4569 = vpow2.f32 %v2155_v41  ;;  %v2598_v20 = vsub.f32 %v5532_v28, %v2579_v2 }
 0x5cc   : > { %v5644_v23 = vpop.eup %4559  ;;  %v2628_v55 = vmul.f32 1.442695, %v2599_v49 }
 0x5cd   : > { %v5646_v32 = vpop.eup %4561  ;;  %v2626_v47 = vmul.f32 1.442695, %v2598_v20  ;;  %2185 = vadd.xlane.f32.xlu1 %v5644_v23  ;;  %v2585_v39 = vpop.xlane.xlu1 %2584 }
 0x5ce   : > { %4571 = vpow2.f32 %v2628_v55  ;;  %v2601_v38 = vsub.f32 %v5541_v27, %v2585_v39  ;;  %2183 = vadd.xlane.f32.xlu0 %v5646_v32  ;;  %v2583_v54 = vpop.xlane.xlu0 %2582 }
 0x5cf   : > { %4573 = vpow2.f32 %v2626_v47  ;;  %v2600_v51 = vsub.f32 %v5544_v30, %v2583_v54 }
 0x5d0   : > { %v5652_v4 = vpop.eup %4563  ;;  %v2632_v28 = vmul.f32 1.442695, %v2601_v38 }
 0x5d1   : > { %v5654_v37 = vpop.eup %4565  ;;  %v2630_v19 = vmul.f32 1.442695, %v2600_v51  ;;  %2656 = vadd.xlane.f32.xlu1 %v5652_v4 }
 0x5d2   : > { %4575 = vpow2.f32 %v2632_v28  ;;  %2654 = vadd.xlane.f32.xlu0 %v5654_v37 }
 0x5d3   : > { %4577 = vpow2.f32 %v2630_v19 }
 0x5d4   : > { %v5658_v58 = vpop.eup %4567 }
 0x5d5   : > { %v5660_v27 = vpop.eup %4569  ;;  %2189 = vadd.xlane.f32.xlu1 %v5658_v58 }
 0x5d6   : > { %2187 = vadd.xlane.f32.xlu0 %v5660_v27 }
 0x5d8   : > { %v5664_v30 = vpop.eup %4571 }
 0x5d9   : > { %v5666_v29 = vpop.eup %4573  ;;  %2660 = vadd.xlane.f32.xlu1 %v5664_v30 }
 0x5da   : > { %2658 = vadd.xlane.f32.xlu0 %v5666_v29 }
 0x5dc   : > { %v5670_v21 = vpop.eup %4575 }
 0x5dd   : > { %v5672_v52 = vpop.eup %4577  ;;  %2664 = vadd.xlane.f32.xlu1 %v5670_v21 }
 0x5de   : > { %2662 = vadd.xlane.f32.xlu0 %v5672_v52 }
 0x62a   : > { %v2162_v17 = vpop.xlane.xlu1 %2161 }
 0x62b   : > { %4579 = vrcp.f32 %v2162_v17  ;;  %v2160_v56 = vpop.xlane.xlu0 %2159 }
 0x62c   : > { %4581 = vrcp.f32 %v2160_v56 }
 0x632   : > { %v2166_v3 = vpop.xlane.xlu1 %2165 }
 0x633   : > { %4583 = vrcp.f32 %v2166_v3  ;;  %v2164_v44 = vpop.xlane.xlu0 %2163 }
 0x634   : > { %4585 = vrcp.f32 %v2164_v44 }
 0x635   : > { %v4580_v48 = vpop.eup %4579 }
 0x636   : > { %v4582_v5 = vpop.eup %4581  ;;  %v2637_v42 = vpop.xlane.xlu1 %2636  ;;  %v2208_v18 = vmul.f32 %v4580_v48, %v5554_v45 }
 0x637   : > { %4587 = vrcp.f32 %v2637_v42  ;;  %v2635_v22 = vpop.xlane.xlu0 %2634  ;;  %v2207_v41 = vmul.f32 %v4582_v5, %v5556_v34 }
 0x638   : > { %4589 = vrcp.f32 %v2635_v22  ;;  %3208 = vst [vmem:[%s5311_s17 + $0x108] sm:$0xff] %v2208_v18 }
 0x639   : > { %3207 = vst [vmem:[%s5311_s17 + $0x100] sm:$0xff] %v2207_v41  ;;  %v4241_v59 = vpack.c.bf16 %v2208_v18, %v2207_v41 }
 0x63a   : > { %v2170_v49 = vpop.xlane.xlu1 %2169 }
 0x63b   : > { %4591 = vrcp.f32 %v2170_v49  ;;  %4242 = vmatprep.subr.bf16.mxu0 %v4241_v59  ;;  %v2168_v2 = vpop.xlane.xlu0 %2167 }
 0x63c   : > { %4593 = vrcp.f32 %v2168_v2  ;;  %4244 = vmatpush3.bf16.xpose.msra.mxu0 %v4241_v59 }
 0x63d   : > { %v4584_v20 = vpop.eup %4583 }
 0x63e   : > { %v4586_v55 = vpop.eup %4585  ;;  %v2641_v47 = vpop.xlane.xlu1 %2640  ;;  %v2210_v45 = vmul.f32 %v4584_v20, %v5564_v57 }
 0x63f   : > { %4595 = vrcp.f32 %v2641_v47  ;;  %v2639_v39 = vpop.xlane.xlu0 %2638  ;;  %v2209_v34 = vmul.f32 %v4586_v55, %v5566_v50 }
 0x640   : > { %4597 = vrcp.f32 %v2639_v39  ;;  %3210 = vst [vmem:[%s5311_s17 + $0x118] sm:$0xff] %v2210_v45 }
 0x641   : > { %v4588_v38 = vpop.eup %4587  ;;  %3209 = vst [vmem:[%s5311_s17 + $0x110] sm:$0xff] %v2209_v34  ;;  %v4245_v54 = vpack.c.bf16 %v2210_v45, %v2209_v34 }
 0x642   : > { %v4590_v51 = vpop.eup %4589  ;;  %v2174_v28 = vpop.xlane.xlu1 %2173  ;;  %v2683_v19 = vmul.f32 %v4588_v38, %v5572_v61 }
 0x643   : > { %4599 = vrcp.f32 %v2174_v28  ;;  %4246 = vmatprep.subr.bf16.mxu0 %v4245_v54  ;;  %v2172_v17 = vpop.xlane.xlu0 %2171  ;;  %v2682_v57 = vmul.f32 %v4590_v51, %v5574_v62 }
 0x644   : > { %4601 = vrcp.f32 %v2172_v17  ;;  %4248 = vmatpush3.bf16.xpose.msra.mxu0 %v4245_v54  ;;  %3240 = vst [vmem:[%s5311_s17 + $0x188] sm:$0xff] %v2683_v19 }
 0x645   : > { %v4592_v50 = vpop.eup %4591  ;;  %3239 = vst [vmem:[%s5311_s17 + $0x180] sm:$0xff] %v2682_v57  ;;  %v4281_v56 = vpack.c.bf16 %v2683_v19, %v2682_v57 }
 0x646   : > { %v4594_v3 = vpop.eup %4593  ;;  %v2645_v44 = vpop.xlane.xlu1 %2644  ;;  %v2212_v48 = vmul.f32 %v4592_v50, %v5580_v25 }
 0x647   : > { %4603 = vrcp.f32 %v2645_v44  ;;  %4282 = vmatprep.subr.bf16.mxu1 %v4281_v56  ;;  %v2643_v61 = vpop.xlane.xlu0 %2642  ;;  %v2211_v5 = vmul.f32 %v4594_v3, %v5582_v1 }
 0x648   : > { %4605 = vrcp.f32 %v2643_v61  ;;  %4284 = vmatpush3.bf16.xpose.msra.mxu1 %v4281_v56  ;;  %3212 = vst [vmem:[%s5311_s17 + $0x128] sm:$0xff] %v2212_v48 }
 0x649   : > { %v4596_v62 = vpop.eup %4595  ;;  %3211 = vst [vmem:[%s5311_s17 + $0x120] sm:$0xff] %v2211_v5  ;;  %v4249_v42 = vpack.c.bf16 %v2212_v48, %v2211_v5 }
 0x64a   : > { %v4598_v18 = vpop.eup %4597  ;;  %v2178_v22 = vpop.xlane.xlu1 %2177  ;;  %v2685_v41 = vmul.f32 %v4596_v62, %v5588_v16 }
 0x64b   : > { %4607 = vrcp.f32 %v2178_v22  ;;  %4250 = vmatprep.subr.bf16.mxu0 %v4249_v42  ;;  %v2176_v25 = vpop.xlane.xlu0 %2175  ;;  %v2684_v59 = vmul.f32 %v4598_v18, %v5590_v6 }
 0x64c   : > { %4609 = vrcp.f32 %v2176_v25  ;;  %4252 = vmatpush3.bf16.xpose.msra.mxu0 %v4249_v42  ;;  %3242 = vst [vmem:[%s5311_s17 + $0x198] sm:$0xff] %v2685_v41 }
 0x64d   : > { %v4600_v1 = vpop.eup %4599  ;;  %3241 = vst [vmem:[%s5311_s17 + $0x190] sm:$0xff] %v2684_v59  ;;  %v4285_v49 = vpack.c.bf16 %v2685_v41, %v2684_v59 }
 0x64e   : > { %v4602_v2 = vpop.eup %4601  ;;  %v2649_v20 = vpop.xlane.xlu1 %2648  ;;  %v2214_v55 = vmul.f32 %v4600_v1, %v5596_v13 }
 0x64f   : > { %4611 = vrcp.f32 %v2649_v20  ;;  %4286 = vmatprep.subr.bf16.mxu1 %v4285_v49  ;;  %v2647_v16 = vpop.xlane.xlu0 %2646  ;;  %v2213_v47 = vmul.f32 %v4602_v2, %v5598_v31 }
 0x650   : > { %4613 = vrcp.f32 %v2647_v16  ;;  %4288 = vmatpush3.bf16.xpose.msra.mxu1 %v4285_v49  ;;  %3214 = vst [vmem:[%s5311_s17 + $0x138] sm:$0xff] %v2214_v55 }
 0x651   : > { %v4604_v6 = vpop.eup %4603  ;;  %3213 = vst [vmem:[%s5311_s17 + $0x130] sm:$0xff] %v2213_v47  ;;  %v4253_v45 = vpack.c.bf16 %v2214_v55, %v2213_v47 }
 0x652   : > { %v4606_v39 = vpop.eup %4605  ;;  %v2182_v34 = vpop.xlane.xlu1 %2181  ;;  %v2687_v38 = vmul.f32 %v4604_v6, %v5604_v53 }
 0x653   : > { %4615 = vrcp.f32 %v2182_v34  ;;  %4254 = vmatprep.subr.bf16.mxu0 %v4253_v45  ;;  %v2180_v13 = vpop.xlane.xlu0 %2179  ;;  %v2686_v54 = vmul.f32 %v4606_v39, %v5606_v0 }
 0x654   : > { %4617 = vrcp.f32 %v2180_v13  ;;  %4256 = vmatpush3.bf16.xpose.msra.mxu0 %v4253_v45  ;;  %3244 = vst [vmem:[%s5311_s17 + $0x1a8] sm:$0xff] %v2687_v38 }
 0x655   : > { %v4608_v31 = vpop.eup %4607  ;;  %3243 = vst [vmem:[%s5311_s17 + $0x1a0] sm:$0xff] %v2686_v54  ;;  %v4289_v51 = vpack.c.bf16 %v2687_v38, %v2686_v54 }
 0x656   : > { %v4610_v28 = vpop.eup %4609  ;;  %v2653_v19 = vpop.xlane.xlu1 %2652  ;;  %v2216_v17 = vmul.f32 %v4608_v31, %v5612_v24 }
 0x657   : > { %4619 = vrcp.f32 %v2653_v19  ;;  %4290 = vmatprep.subr.bf16.mxu1 %v4289_v51  ;;  %v2651_v53 = vpop.xlane.xlu0 %2650  ;;  %v2215_v57 = vmul.f32 %v4610_v28, %v5614_v26 }
 0x658   : > { %4621 = vrcp.f32 %v2651_v53  ;;  %4292 = vmatpush3.bf16.xpose.msra.mxu1 %v4289_v51  ;;  %3216 = vst [vmem:[%s5311_s17 + $0x148] sm:$0xff] %v2216_v17 }
 0x659   : > { %v4612_v0 = vpop.eup %4611  ;;  %3215 = vst [vmem:[%s5311_s17 + $0x140] sm:$0xff] %v2215_v57  ;;  %v4257_v50 = vpack.c.bf16 %v2216_v17, %v2215_v57 }
 0x65a   : > { %v4614_v56 = vpop.eup %4613  ;;  %v2186_v3 = vpop.xlane.xlu1 %2185  ;;  %v2689_v44 = vmul.f32 %v4612_v0, %v5620_v15  ;;  %v2805_v0 = vld [vmem:[%s5882_s6 + $0x8] sm:$0xff] }
 0x65b   : > { %4623 = vrcp.f32 %v2186_v3  ;;  %4258 = vmatprep.subr.bf16.mxu0 %v4257_v50  ;;  %v2184_v24 = vpop.xlane.xlu0 %2183  ;;  %v2688_v48 = vmul.f32 %v4614_v56, %v5622_v7  ;;  %v2807_v56 = vld [vmem:[%s5882_s6 + $0x18] sm:$0xff]  ;;  %v2808_v3 = vld [vmem:[%s5882_s6 + $0x20] sm:$0xff] }
 0x65c   : > { %4625 = vrcp.f32 %v2184_v24  ;;  %4260 = vmatpush3.bf16.xpose.msra.mxu0 %v4257_v50  ;;  %3246 = vst [vmem:[%s5311_s17 + $0x1b8] sm:$0xff] %v2689_v44  ;;  %v2806_v50 = vld [vmem:[%s5882_s6 + $0x10] sm:$0xff] }
 0x65d   : > { %v4616_v26 = vpop.eup %4615  ;;  %3245 = vst [vmem:[%s5311_s17 + $0x1b0] sm:$0xff] %v2688_v48  ;;  %v4293_v61 = vpack.c.bf16 %v2689_v44, %v2688_v48  ;;  %v2809_v44 = vld [vmem:[%s5882_s6 + $0x28] sm:$0xff]  ;;  %v2810_v24 = vld [vmem:[%s5882_s6 + $0x30] sm:$0xff]  ;;  %v2811_v48 = vld [vmem:[%s5882_s6 + $0x38] sm:$0xff] }
 0x65e   : > { %v4618_v5 = vpop.eup %4617  ;;  %v2657_v62 = vpop.xlane.xlu1 %2656  ;;  %v2218_v42 = vmul.f32 %v4616_v26, %v5628_v9  ;;  %v2812_v26 = vld [vmem:[%s5882_s6 + $0x40] sm:$0xff] }
 0x65f   : > { %4627 = vrcp.f32 %v2657_v62  ;;  %4294 = vmatprep.subr.bf16.mxu1 %v4293_v61  ;;  %v2655_v15 = vpop.xlane.xlu0 %2654  ;;  %v2217_v18 = vmul.f32 %v4618_v5, %v5630_v46  ;;  %v2814_v5 = vld [vmem:[%s5882_s6 + $0x50] sm:$0xff]  ;;  %v2815_v62 = vld [vmem:[%s5882_s6 + $0x58] sm:$0xff] }
 0x660   : > { %4629 = vrcp.f32 %v2655_v15  ;;  %4296 = vmatpush3.bf16.xpose.msra.mxu1 %v4293_v61  ;;  %3218 = vst [vmem:[%s5311_s17 + $0x158] sm:$0xff] %v2218_v42  ;;  %v2813_v61 = vld [vmem:[%s5882_s6 + $0x48] sm:$0xff] }
 0x661   : > { %v4620_v7 = vpop.eup %4619  ;;  %3217 = vst [vmem:[%s5311_s17 + $0x150] sm:$0xff] %v2217_v18  ;;  %v4261_v22 = vpack.c.bf16 %v2218_v42, %v2217_v18  ;;  %v2816_v42 = vld [vmem:[%s5882_s6 + $0x60] sm:$0xff]  ;;  %v2817_v15 = vld [vmem:[%s5882_s6 + $0x68] sm:$0xff]  ;;  %v2818_v18 = vld [vmem:[%s5882_s6 + $0x70] sm:$0xff] }
 0x662   : > { %v4622_v41 = vpop.eup %4621  ;;  %v2190_v25 = vpop.xlane.xlu1 %2189  ;;  %v2691_v59 = vmul.f32 %v4620_v7, %v5636_v11  ;;  %v2819_v7 = vld [vmem:[%s5882_s6 + $0x78] sm:$0xff] }
 0x663   : > { %4631 = vrcp.f32 %v2190_v25  ;;  %4262 = vmatprep.subr.bf16.mxu0 %v4261_v22  ;;  %v2188_v9 = vpop.xlane.xlu0 %2187  ;;  %v2690_v1 = vmul.f32 %v4622_v41, %v5638_v14 }
 0x664   : > { %4633 = vrcp.f32 %v2188_v9  ;;  %4264 = vmatpush3.bf16.xpose.msra.mxu0 %v4261_v22  ;;  %3248 = vst [vmem:[%s5311_s17 + $0x1c8] sm:$0xff] %v2691_v59 }
 0x665   : > { %v4624_v46 = vpop.eup %4623  ;;  %3247 = vst [vmem:[%s5311_s17 + $0x1c0] sm:$0xff] %v2690_v1  ;;  %v4297_v49 = vpack.c.bf16 %v2691_v59, %v2690_v1 }
 0x666   : > { %v4626_v2 = vpop.eup %4625  ;;  %v2661_v20 = vpop.xlane.xlu1 %2660  ;;  %v2220_v55 = vmul.f32 %v4624_v46, %v5644_v23 }
 0x667   : > { %4635 = vrcp.f32 %v2661_v20  ;;  %4298 = vmatprep.subr.bf16.mxu1 %v4297_v49  ;;  %v2659_v11 = vpop.xlane.xlu0 %2658  ;;  %v2219_v16 = vmul.f32 %v4626_v2, %v5646_v32 }
 0x668   : > { %4637 = vrcp.f32 %v2659_v11  ;;  %4300 = vmatpush3.bf16.xpose.msra.mxu1 %v4297_v49  ;;  %3220 = vst [vmem:[%s5311_s17 + $0x168] sm:$0xff] %v2220_v55 }
 0x669   : > { %v4628_v14 = vpop.eup %4627  ;;  %3219 = vst [vmem:[%s5311_s17 + $0x160] sm:$0xff] %v2219_v16  ;;  %v4265_v47 = vpack.c.bf16 %v2220_v55, %v2219_v16 }
 0x66a   : > { %v4630_v6 = vpop.eup %4629  ;;  %v2665_v45 = vpop.xlane.xlu1 %2664  ;;  %v2693_v39 = vmul.f32 %v4628_v14, %v5652_v4 }
 0x66b   : > { %4639 = vrcp.f32 %v2665_v45  ;;  %4266 = vmatprep.subr.bf16.mxu0 %v4265_v47  ;;  %v2663_v23 = vpop.xlane.xlu0 %2662  ;;  %v2692_v34 = vmul.f32 %v4630_v6, %v5654_v37 }
 0x66c   : > { %4641 = vrcp.f32 %v2663_v23  ;;  %4268 = vmatpush3.bf16.xpose.msra.mxu0 %v4265_v47  ;;  %3250 = vst [vmem:[%s5311_s17 + $0x1d8] sm:$0xff] %v2693_v39 }
 0x66d   : > { %v4632_v32 = vpop.eup %4631  ;;  %3249 = vst [vmem:[%s5311_s17 + $0x1d0] sm:$0xff] %v2692_v34  ;;  %v4301_v38 = vpack.c.bf16 %v2693_v39, %v2692_v34 }
 0x66e   : > { %v4634_v13 = vpop.eup %4633  ;;  %v2222_v54 = vmul.f32 %v4632_v32, %v5658_v58 }
 0x66f   : > { %4302 = vmatprep.subr.bf16.mxu1 %v4301_v38  ;;  %v2221_v4 = vmul.f32 %v4634_v13, %v5660_v27 }
 0x670   : > { %4304 = vmatpush3.bf16.xpose.msra.mxu1 %v4301_v38  ;;  %3222 = vst [vmem:[%s5311_s17 + $0x178] sm:$0xff] %v2222_v54 }
 0x671   : > { %v4636_v31 = vpop.eup %4635  ;;  %3221 = vst [vmem:[%s5311_s17 + $0x170] sm:$0xff] %v2221_v4  ;;  %v4269_v51 = vpack.c.bf16 %v2222_v54, %v2221_v4 }
 0x672   : > { %v4638_v37 = vpop.eup %4637  ;;  %v2695_v28 = vmul.f32 %v4636_v31, %v5664_v30 }
 0x673   : > { %4270 = vmatprep.subr.bf16.mxu0 %v4269_v51  ;;  %v2694_v19 = vmul.f32 %v4638_v37, %v5666_v29 }
 0x674   : > { %4272 = vmatpush3.bf16.xpose.msra.mxu0 %v4269_v51  ;;  %3252 = vst [vmem:[%s5311_s17 + $0x1e8] sm:$0xff] %v2695_v28 }
 0x675   : > { %v4640_v58 = vpop.eup %4639  ;;  %4314 = vmatprep.subr.bf16.mxu0 %v5444_v43  ;;  %3251 = vst [vmem:[%s5311_s17 + $0x1e0] sm:$0xff] %v2694_v19  ;;  %v4305_v27 = vpack.c.bf16 %v2695_v28, %v2694_v19 }
 0x676   : > { %v4642_v17 = vpop.eup %4641  ;;  %v2697_v53 = vmul.f32 %v4640_v58, %v5670_v21 }
 0x677   : > { %4306 = vmatprep.subr.bf16.mxu1 %v4305_v27  ;;  %v2696_v57 = vmul.f32 %v4642_v17, %v5672_v52 }
 0x678   : > { %4308 = vmatpush3.bf16.xpose.msra.mxu1 %v4305_v27  ;;  %3254 = vst [vmem:[%s5311_s17 + $0x1f8] sm:$0xff] %v2697_v53 }
 0x679   : > { %3253 = vst [vmem:[%s5311_s17 + $0x1f0] sm:$0xff] %v2696_v57  ;;  %v4309_v30 = vpack.c.bf16 %v2697_v53, %v2696_v57  ;;  %s4647_s17 = sshll.u32 %s4707_s9, 4  ;;  %s4648_s17 = int_to_ptr.vmem [resolvable:$false] %s4647_s17 }
 0x67a   : > { %s4649_s13 = scalar_lea.vmem %s4648_s17, 16384  ;;  %p4650_p0 = scmp.lt.s32.totalorder %s5809_s21, %s4648_s17 }
 0x67b   : > { %3926 = vmatmul.mubr.f32.vlgmr.msra.gmra.mrb[52].mxu0 %v5425_v63  ;;  %4310 = vmatprep.subr.bf16.mxu1 %v4309_v30  ;;  %v2804_v63 = vld [vmem:[%s5882_s6] sm:$0xff]  ;;  %p4651_p1 = scmp.lt.s32.totalorder %s4649_s13, %s4643_s10 }
 0x67c   : > { %3928 = vmatprep.mubr.f32.mxu0 %v5432_v36  ;;  %4316 = vmatpush3.bf16.msra.mxu0 %v5444_v43 }
 0x67d   : > { %4318 = vmatprep.subr.bf16.mxu0 %v5446_v40  ;;  %p4652_p2 = por %p4651_p1, %p4650_p0 }
 0x67f   : > { %3929 = vmatmul.mubr.f32.gmra.mrb[54].mxu0 %v5429_v12  ;;  %p4653_p3 = pnand %p4652_p2, %p4646_p13 }
 0x680   : > { %4312 = vmatpush3.bf16.xpose.msra.mxu1 %v4309_v30  ;;  %4320 = vmatpush3.bf16.msra.mxu0 %v5446_v40 }
 0x681   : > { %4322 = vmatprep.subr.bf16.mxu0 %v5448_v35  ;;  %4033 = vmatprep.mubr.f32.mxu0 %v2804_v63 }
 0x684   : > { %4324 = vmatpush3.bf16.msra.mxu0 %v5448_v35 }
 0x685   : > { %4326 = vmatprep.subr.bf16.mxu0 %v5450_v60 }
 0x687   : > { %3996 = vmatmul.mubr.f32.vlgmr.msra.gmra.mrb[68].mxu1 %v5435_v33 }
 0x688   : > { %3998 = vmatprep.mubr.f32.mxu1 %v5441_v10  ;;  %4328 = vmatpush3.bf16.msra.mxu0 %v5450_v60 }
 0x68b   : > { %3999 = vmatmul.mubr.f32.gmra.mrb[70].mxu1 %v5439_v8 }
 0x74e   : > { %v3927_v12 = vpop.f32.mrb[52].mxu0 }
 0x74f   : > { %v2306_v36 = vpop.f32.mrb[53].mxu0 }
 0x750   : > { %v4329_v43 = vpack.c.bf16 %v3927_v12, %v2306_v36 }
 0x752   : > { %v3930_v40 = vpop.f32.mrb[54].mxu0  ;;  %4330 = vmatprep.subr.bf16.mxu0 %v4329_v43 }
 0x753   : > { %v2316_v35 = vpop.f32.mrb[55].mxu0  ;;  %4332 = vmatpush3.bf16.msra.mxu0 %v4329_v43 }
 0x754   : > { %v4333_v29 = vpack.c.bf16 %v3930_v40, %v2316_v35 }
 0x756   : > { %4334 = vmatprep.subr.bf16.mxu0 %v4333_v29 }
 0x757   : > { %4336 = vmatpush3.bf16.msra.mxu0 %v4333_v29 }
 0x75a   : > { %v3997_v33 = vpop.f32.mrb[68].mxu1 }
 0x75b   : > { %v2781_v10 = vpop.f32.mrb[69].mxu1 }
 0x75c   : > { %v4337_v60 = vpack.c.bf16 %v3997_v33, %v2781_v10 }
 0x75e   : > { %v4000_v21 = vpop.f32.mrb[70].mxu1  ;;  %4338 = vmatprep.subr.bf16.mxu0 %v4337_v60 }
 0x75f   : > { %v2791_v8 = vpop.f32.mrb[71].mxu1  ;;  %4340 = vmatpush3.bf16.msra.mxu0 %v4337_v60 }
 0x760   : > { %v4341_v52 = vpack.c.bf16 %v4000_v21, %v2791_v8 }
 0x762   : > { %4342 = vmatprep.subr.bf16.mxu0 %v4341_v52 }
 0x763   : > { %4344 = vmatpush3.bf16.msra.mxu0 %v4341_v52 }
 0x766   : > { %4034 = vmatmul.mubr.f32.vlgmr.msra.gmra.mrb[56].mxu0 %v2805_v0 }
 0x767   : > { %4036 = vmatprep.mubr.f32.mxu0 %v2806_v50 }
 0x76a   : > { %4037 = vmatmul.mubr.f32.gmra.mrb[58].mxu0 %v2807_v56 }
 0x76b   : > { %4039 = vmatprep.mubr.f32.mxu0 %v2808_v3 }
 0x76e   : > { %4040 = vmatmul.mubr.f32.gmra.mrb[60].mxu0 %v2809_v44 }
 0x76f   : > { %4042 = vmatprep.mubr.f32.mxu0 %v2810_v24 }
 0x772   : > { %4043 = vmatmul.mubr.f32.gmra.mrb[62].mxu0 %v2811_v48 }
 0x773   : > { %4045 = vmatprep.mubr.f32.mxu0 %v2812_v26 }
 0x776   : > { %4046 = vmatmul.mubr.f32.gmra.mrb[64].mxu0 %v2813_v61 }
 0x777   : > { %4048 = vmatprep.mubr.f32.mxu0 %v2814_v5 }
 0x77a   : > { %4049 = vmatmul.mubr.f32.gmra.mrb[66].mxu0 %v2815_v62 }
 0x77b   : > { %4051 = vmatprep.mubr.f32.mxu0 %v2816_v42 }
 0x77e   : > { %4052 = vmatmul.mubr.f32.gmra.mrb[68].mxu0 %v2817_v15 }
 0x77f   : > { %4054 = vmatprep.mubr.f32.mxu0 %v2818_v18 }
 0x782   : > { %4055 = vmatmul.mubr.f32.gmra.mrb[70].mxu0 %v2819_v7 }
 0x783   : > { %4656 = shalt.err (!%p4653_p3)
}
 0x784   : > { %s4657_s18 = scalar_lea.hbm %s5807_s12, 8192  ;;  %s4661_s23 = scalar_lea.hbm %s5884_s8, 16384 }
 0x785   : > { %p4658_p4 = scmp.ne.s32.totalorder %s5807_s12, %s4657_s18  ;;  %p4662_p9 = scmp.lt.u32.totalorder %s5807_s12, %s5884_s8 }
 0x786   : > { %p4663_p10 = scmp.lt.u32.totalorder %s4661_s23, %s4657_s18  ;;  %p4665_p12 = scmp.lt.u32.totalorder %s4657_s18, %s5807_s12 }
 0x787   : > { %p4659_p7 = pnand %p4658_p4, %p4793_p5 }
 0x788   : > { %p4664_p11 = por %p4663_p10, %p4662_p9 }
 0x789   : > { %p4660_p8 = pneg %p4659_p7 }
 0x78a   : > { %p4666_p13 = por %p4665_p12, %p4664_p11 }
 0x78c   : > { %p4667_p0 = pnand %p4666_p13, %p4660_p8 }
 0x78e   : > { %4670 = shalt.err (!%p4667_p0)
}
 0x78f   : > { %s4708_s10 = smov 128   ;;  %s4709_s9 = smov 8  }
 0x790   : > { %4345 = dma.vmem_to_hbm [thread:$0]  (%p4793_p5), %s5809_s21, 8192, %s5807_s12, %s5813_s26, %s4708_s10, %s4708_s10, %s4709_s9  }
 0x791   : > { %s5841_s19 = scalar_lea.vmem %s5883_s7, %s4811_s22 }
 0x839   : > { %v4035_v22 = vpop.f32.mrb[56].mxu0 }
 0x83a   : > { %2982 = vst [vmem:[%s5841_s19 + $0x8] sm:$0xff] %v4035_v22  ;;  %v2902_v41 = vpop.f32.mrb[57].mxu0 }
 0x83b   : > { %2981 = vst [vmem:[%s5841_s19] sm:$0xff] %v2902_v41 }
 0x83d   : > { %v4038_v25 = vpop.f32.mrb[58].mxu0 }
 0x83e   : > { %2984 = vst [vmem:[%s5841_s19 + $0x18] sm:$0xff] %v4038_v25  ;;  %v2912_v59 = vpop.f32.mrb[59].mxu0 }
 0x83f   : > { %2983 = vst [vmem:[%s5841_s19 + $0x10] sm:$0xff] %v2912_v59 }
 0x841   : > { %v4041_v9 = vpop.f32.mrb[60].mxu0 }
 0x842   : > { %2986 = vst [vmem:[%s5841_s19 + $0x28] sm:$0xff] %v4041_v9  ;;  %v2922_v1 = vpop.f32.mrb[61].mxu0 }
 0x843   : > { %2985 = vst [vmem:[%s5841_s19 + $0x20] sm:$0xff] %v2922_v1 }
 0x845   : > { %v4044_v46 = vpop.f32.mrb[62].mxu0 }
 0x846   : > { %2988 = vst [vmem:[%s5841_s19 + $0x38] sm:$0xff] %v4044_v46  ;;  %v2932_v49 = vpop.f32.mrb[63].mxu0 }
 0x847   : > { %2987 = vst [vmem:[%s5841_s19 + $0x30] sm:$0xff] %v2932_v49 }
 0x849   : > { %v4047_v2 = vpop.f32.mrb[64].mxu0 }
 0x84a   : > { %2990 = vst [vmem:[%s5841_s19 + $0x48] sm:$0xff] %v4047_v2  ;;  %v2942_v20 = vpop.f32.mrb[65].mxu0 }
 0x84b   : > { %2989 = vst [vmem:[%s5841_s19 + $0x40] sm:$0xff] %v2942_v20 }
 0x84d   : > { %v4050_v55 = vpop.f32.mrb[66].mxu0 }
 0x84e   : > { %2992 = vst [vmem:[%s5841_s19 + $0x58] sm:$0xff] %v4050_v55  ;;  %v2952_v11 = vpop.f32.mrb[67].mxu0 }
 0x84f   : > { %2991 = vst [vmem:[%s5841_s19 + $0x50] sm:$0xff] %v2952_v11 }
 0x851   : > { %v4053_v16 = vpop.f32.mrb[68].mxu0 }
 0x852   : > { %2994 = vst [vmem:[%s5841_s19 + $0x68] sm:$0xff] %v4053_v16  ;;  %v2962_v14 = vpop.f32.mrb[69].mxu0 }
 0x853   : > { %2993 = vst [vmem:[%s5841_s19 + $0x60] sm:$0xff] %v2962_v14 }
 0x855   : > { %v4056_v47 = vpop.f32.mrb[70].mxu0 }
 0x856   : > { %2996 = vst [vmem:[%s5841_s19 + $0x78] sm:$0xff] %v4056_v47  ;;  %v2972_v6 = vpop.f32.mrb[71].mxu0 }
 0x857   : > { %2995 = vst [vmem:[%s5841_s19 + $0x70] sm:$0xff] %v2972_v6 }
 0x858 PF: > { %p4351_p5 = scmp.ge.s32.totalorder %s4705_s30, 2  ;;  %s3042_s15 = sand.u32 1, %s4693_s27  }
 0x859   : > { %s3043_s22 = scalar_lea.sflag [#allocation4], %s3042_s15 }
 0x85a   : > { %p4348_p1 = pnand %p4351_p5, %p4797_p6 }
 0x85c   : > { %4688 = dma.done.wait (!%p4348_p1), %s3043_s22, 8192  }
 0x85d   : > { %4690 = vsyncadd (!%p4348_p1), %s3043_s22, 4294959104  ;;  %p19_p2 = scmp.ge.s32.totalorder %s4780_s11, 4   ;;  %s5889_s27 = smov %s4697_s28 }
 0x85e   : > { %s5890_s28 = smov %s4701_s29  ;;  %s5891_s29 = smov %s4791_s14 }
 0x85f   : > { %s5892_s30 = smov %s4780_s11  ;;  %21 = sbr.rel (!%p19_p2) target bundleno = 3 (0x3), region = 104 }
 0x866   :  { %3048 = vsyncpa [#allocation4], 1 }
 0x867   :  { %3050 = vsyncpa [#allocation4 + $0x1], 1 }

</bundles_post_ra>
